<compile_context>
chip_gen: v7x
topology: tpu7x:2x2x1
jax: 0.10.0
libtpu: 0.0.40
codegen_flags: <defaults>
</compile_context>

<pallas_src>
import functools

import jax
import jax.numpy as jnp
from jax import lax
from jax.experimental import pallas as pl
from jax.experimental.pallas import tpu as pltpu

NEG_INF = -1e9       # finite stand-in for -inf (keeps the log-space math NaN-free)
_CHUNK = 8           # static unroll depth of the CTC recursion inner loop


def _round_up(x, m):
    return ((x + m - 1) // m) * m


def _pick_batch_tile(B):
    # Several vregs of alpha rows per step (fills the EUP/VPU pipelines); on
    # v7x first guarantee >=2 blocks on the parallel batch axis (2 TCs), then
    # grow the tile.  Second-minor block dims must be 8-divisible or full.
    if B % 8 != 0:
        return B
    for bb in (32, 16, 8):
        if B % bb == 0 and B // bb >= 2:
            return bb
    for bb in (32, 16, 8):
        if B % bb == 0:
            return bb
    return 8


def _pick_time_tile(T, V, H, LP, bb, in_bytes):
    # tt is the M dim of the gather matmul and amortizes per-grid-step
    # overhead: target up to 128 steps/block, but keep the per-block footprint
    # comfortably inside v7x's 64 MiB/TC VMEM (double-buffered inputs + f32
    # temporaries + one-hot scratch).
    budget = 20 * 1024 * 1024
    tt = min(128, _round_up(max(T, 1), 16))
    while tt > 16:
        per_block = bb * tt * (2 * V * in_bytes      # logits, double buffered
                               + 2 * H * in_bytes    # visual, double buffered
                               + 2 * V * 4           # f32 upcast / exp temporary
                               + 3 * LP * 4)         # gather result + lp scratch
        per_block += bb * V * LP * in_bytes          # one-hot gather matrix
        if per_block <= budget:
            break
        tt -= 16
    return tt


# ---------------------------------------------------------------------------
# Kernel 1: per-batch-tile CTC loss (de-interleaved alpha recursion) + visual
#           mean-pool.  grid = (batch_tiles, time_blocks).
# ---------------------------------------------------------------------------
def _ctc_pool_kernel(logits_ref, colv_ref, allow_ref, ilen_ref, tlen_ref, vis_ref,
                     ctc_ref, vavg_ref,
                     onehot_scr, ab_scr, al_scr, lp_scr, *,
                     num_labels, total_T):
    f32 = jnp.float32
    t_blk = pl.program_id(1)
    n_tblk = pl.num_programs(1)

    x = logits_ref[...]                       # [bb, tt, V], native dtype (bf16 ok)
    bb, tt, V = x.shape
    L = num_labels
    LP = ab_scr.shape[1]                      # label lanes padded to k*128 (>= L+1)
    nc = tt // _CHUNK

    # ---- per-batch-tile setup (first time block only) -----------------------
    @pl.when(t_blk == 0)
    def _init():
        # Lane-dense one-hot gather matrix [bb, V, LP]: lanes [0, L) select the
        # label ids, lane L selects the blank id, remaining lanes stay zero.
        colv = colv_ref[...]                                        # [bb, LP] int32
        v_iota = lax.broadcasted_iota(jnp.int32, (bb, V, LP), 1)
        onehot_scr[...] = (v_iota == colv[:, None, :]).astype(onehot_scr.dtype)
        jj0 = lax.broadcasted_iota(jnp.int32, (bb, LP), 1)
        # "virtual alpha_{-1}": one uniform recursion step yields alpha_0.
        ab_scr[...] = jnp.where(jj0 == 0, 0.0, NEG_INF)
        al_scr[...] = jnp.full((bb, LP), NEG_INF, f32)
        vavg_ref[...] = jnp.zeros_like(vavg_ref)

    # ---- visual mean-pool accumulation ---------------------------------------
    vavg_ref[...] += jnp.sum(vis_ref[...].astype(f32), axis=1)

    # ---- log-softmax of the needed columns only: lp = gathered_logit - lse ----
    xf = x.astype(f32)
    m = jnp.max(xf, axis=-1, keepdims=True)
    lse = m + jnp.log(jnp.sum(jnp.exp(xf - m), axis=-1, keepdims=True))   # [bb,tt,1]
    # Single lane-dense MXU gather (plain [V, LP] RHS orientation, f32 accum).
    g = lax.dot_general(x, onehot_scr[...], (((2,), (1,)), ((0,), (0,))),
                        preferred_element_type=f32)                       # [bb,tt,LP]
    lane = lax.broadcasted_iota(jnp.int32, (bb, tt, LP), 2)
    lp = jnp.where(lane <= L, g - lse, NEG_INF)                           # [bb,tt,LP]

    # Stage into a chunk-major scratch so the recursion can fori_loop over
    # chunks with dynamic leading-axis reads (no giant unroll, no lane
    # relayout: each copy moves whole (CHUNK, LP) tiles).
    for c in range(nc):
        lp_scr[c] = lp[:, c * _CHUNK:(c + 1) * _CHUNK, :]

    # ---- de-interleaved CTC alpha recursion over this time block -------------
    # alpha_blank[j] <-> extended position s=2j,   j in [0, L]
    # alpha_label[j] <-> extended position s=2j+1, j in [0, L-1]
    allow = allow_ref[...] != 0               # [bb, LP] skip allowed into label j
    ilen = ilen_ref[...]                      # [bb, 1]
    jj = lax.broadcasted_iota(jnp.int32, (bb, LP), 1)
    j_ge1 = jj >= 1
    t_base = t_blk * tt

    def chunk_step(c, carry):
        ab, al = carry
        lp_c = lp_scr[c]                      # [bb, CHUNK, LP]
        for s in range(_CHUNK):               # bounded static unroll
            lp_l = lp_c[:, s, :]              # [bb, LP]  (labels; blank at lane L)
            lp_b = lp_l[:, L:L + 1]           # [bb, 1]   blank log-prob
            rolled = jnp.where(j_ge1, pltpu.roll(al, shift=1, axis=1), NEG_INF)
            # blank j: logsumexp(ab, rolled) in one-exp form (EUP critical path)
            d = jnp.abs(ab - rolled)
            new_ab = jnp.maximum(ab, rolled) + jnp.log(1.0 + jnp.exp(-d)) + lp_b
            # label j: predecessors = label j, blank j, (skip) label j-1
            skip = jnp.where(allow, rolled, NEG_INF)
            m3 = jnp.maximum(jnp.maximum(al, ab), skip)
            new_al = m3 + jnp.log(jnp.exp(al - m3) + jnp.exp(ab - m3) +
                                  jnp.exp(skip - m3)) + lp_l
            active = (t_base + c * _CHUNK + s) < ilen    # freeze padded / past-len rows
            ab = jnp.where(active, new_ab, ab)
            al = jnp.where(active, new_al, al)
        return ab, al

    ab, al = lax.fori_loop(0, nc, chunk_step, (ab_scr[...], al_scr[...]))
    ab_scr[...] = ab
    al_scr[...] = al

    # ---- finalize on the last time block --------------------------------------
    @pl.when(t_blk == n_tblk - 1)
    def _finalize():
        vavg_ref[...] = vavg_ref[...] * (1.0 / total_T)
        tl = tlen_ref[...]                    # [bb, 1]
        fb = jnp.where(jj == tl, ab, NEG_INF)        # alpha at s = 2*tlen (blank)
        fl = jnp.where(jj == tl - 1, al, NEG_INF)    # alpha at s = 2*tlen - 1 (label)
        mf = jnp.maximum(jnp.max(fb, axis=1, keepdims=True),
                         jnp.max(fl, axis=1, keepdims=True))
        ll = mf + jnp.log(jnp.sum(jnp.exp(fb - mf), axis=1, keepdims=True) +
                          jnp.sum(jnp.exp(fl - mf), axis=1, keepdims=True))
        loss = -ll
        loss = jnp.where(loss > 1e8, 0.0, loss)      # CTCLoss(zero_infinity=True)
        # TODO(synk): PyTorch semantics for zero-length targets differ; the clamp
        # avoids div-by-zero but does not reproduce that edge case exactly.
        ctc_ref[...] = loss / jnp.maximum(tl, 1).astype(f32)


# ---------------------------------------------------------------------------
# Kernel 2: tiny epilogue -- CTC mean, [B,B] contrastive InfoNCE, combine.
# ---------------------------------------------------------------------------
def _combine_kernel(ctc_ref, vavg_ref, txt_ref, out_ref, *,
                    ctc_weight, contrastive_weight, temperature):
    f32 = jnp.float32
    B = ctc_ref.shape[0]
    ctc = jnp.sum(ctc_ref[...], axis=0, keepdims=True) / B            # (1, 1)

    v = vavg_ref[...]                                                 # [B, H] f32
    t = txt_ref[...].astype(f32)                                      # [B, H]
    # Matches the reference: raw dot-product similarity (no L2 normalization).
    sim = lax.dot_general(v, t, (((1,), (1,)), ((), ())),
                          preferred_element_type=f32) / temperature   # [B, B]

    ri = lax.broadcasted_iota(jnp.int32, (B, B), 0)
    ci = lax.broadcasted_iota(jnp.int32, (B, B), 1)
    eye = (ri == ci).astype(f32)
    diag_r = jnp.sum(sim * eye, axis=1, keepdims=True)                # [B, 1]
    diag_c = jnp.sum(sim * eye, axis=0, keepdims=True)                # [1, B]

    mr = jnp.max(sim, axis=1, keepdims=True)
    lse_r = mr + jnp.log(jnp.sum(jnp.exp(sim - mr), axis=1, keepdims=True))
    mc = jnp.max(sim, axis=0, keepdims=True)
    lse_c = mc + jnp.log(jnp.sum(jnp.exp(sim - mc), axis=0, keepdims=True))

    v2t = jnp.sum(lse_r - diag_r, axis=0, keepdims=True) / B          # (1, 1)
    t2v = jnp.sum(lse_c - diag_c, axis=1, keepdims=True) / B          # (1, 1)
    contrastive = 0.5 * (v2t + t2v)

    total = ctc_weight * ctc + contrastive_weight * contrastive
    out_ref[...] = jnp.concatenate([total, ctc, contrastive], axis=1)  # (1, 3)


# ---------------------------------------------------------------------------
# Wrapper
# ---------------------------------------------------------------------------
def combined_loss(logits, targets, target_lengths, visual_emb, text_emb,
                  input_lengths=None, *, ctc_weight=1.0, contrastive_weight=0.2,
                  temperature=0.07, blank=3):
    """JAX/Pallas equivalent of CombinedLoss.forward -> (total, ctc, contrastive)."""
    B, T, V = logits.shape
    L = targets.shape[1]
    # TODO(synk): the 2-D (already pooled) visual_emb branch of the PyTorch
    # module is not handled here; this path expects [B, T, H].
    H = visual_emb.shape[2]
    if input_lengths is None:
        input_lengths = jnp.full((B,), T, dtype=jnp.int32)

    # ---- tile sizes ----------------------------------------------------------
    bb = _pick_batch_tile(B)
    nb = B // bb
    in_bytes = jnp.dtype(logits.dtype).itemsize
    LP = _round_up(L + 1, 128)                 # label lanes (+blank) padded to 128
    tt = _pick_time_tile(T, V, H, LP, bb, in_bytes)
    T_pad = _round_up(T, tt)
    nt = T_pad // tt
    if T_pad != T:
        # Padded steps are frozen by the `t < input_len` mask; visual padding is
        # zeros so the mean over the original T frames is unchanged.
        logits = jnp.pad(logits, ((0, 0), (0, T_pad - T), (0, 0)))
        visual_emb = jnp.pad(visual_emb, ((0, 0), (0, T_pad - T), (0, 0)))

    # ---- pure integer index glue (outside the kernel) ------------------------
    lbl = targets.astype(jnp.int32)                                   # [B, L]
    lane = jnp.arange(LP, dtype=jnp.int32)[None, :]
    col_val = jnp.where(lane < L, jnp.pad(lbl, ((0, 0), (0, LP - L))), -1)
    col_val = jnp.where(lane == L, jnp.int32(blank), col_val)         # [B, LP]
    prev = jnp.concatenate([jnp.full((B, 1), -1, jnp.int32), lbl[:, :-1]], axis=1)
    j_idx = jnp.arange(L, dtype=jnp.int32)[None, :]
    allow = ((lbl != prev) & (j_idx >= 1)).astype(jnp.int32)          # [B, L]
    allow = jnp.pad(allow, ((0, 0), (0, LP - L)))                     # [B, LP]
    ilen = input_lengths.reshape(B, 1).astype(jnp.int32)
    tlen = target_lengths.reshape(B, 1).astype(jnp.int32)

    # ---- kernel 1: per-row CTC loss + visual mean-pool ------------------------
    kern1 = functools.partial(_ctc_pool_kernel, num_labels=int(L), total_T=int(T))
    ctc_rows, v_avg = pl.pallas_call(
        kern1,
        out_shape=(jax.ShapeDtypeStruct((B, 1), jnp.float32),
                   jax.ShapeDtypeStruct((B, H), jnp.float32)),
        grid_spec=pltpu.PrefetchScalarGridSpec(
            num_scalar_prefetch=0,
            grid=(nb, nt),
            in_specs=[pl.BlockSpec((bb, tt, V), lambda i, t: (i, t, 0)),   # logits
                      pl.BlockSpec((bb, LP),    lambda i, t: (i, 0)),      # col ids
                      pl.BlockSpec((bb, LP),    lambda i, t: (i, 0)),      # allow
                      pl.BlockSpec((bb, 1),     lambda i, t: (i, 0)),      # ilen
                      pl.BlockSpec((bb, 1),     lambda i, t: (i, 0)),      # tlen
                      pl.BlockSpec((bb, tt, H), lambda i, t: (i, t, 0))],  # visual
            out_specs=[pl.BlockSpec((bb, 1), lambda i, t: (i, 0)),
                       pl.BlockSpec((bb, H), lambda i, t: (i, 0))],
            scratch_shapes=[pltpu.VMEM((bb, V, LP), logits.dtype),   # one-hot gather
                            pltpu.VMEM((bb, LP), jnp.float32),       # alpha_blank
                            pltpu.VMEM((bb, LP), jnp.float32),       # alpha_label
                            pltpu.VMEM((tt // _CHUNK, bb, _CHUNK, LP),
                                       jnp.float32)]),               # lp (chunk-major)
        compiler_params=pltpu.CompilerParams(
            dimension_semantics=("parallel", "arbitrary"),
            vmem_limit_bytes=48 * 1024 * 1024),   # tiles sized for v7x's 64 MiB/TC
    )(logits, col_val, allow, ilen, tlen, visual_emb)

    # ---- kernel 2: reduce + contrastive + combine -----------------------------
    kern2 = functools.partial(_combine_kernel,
                              ctc_weight=float(ctc_weight),
                              contrastive_weight=float(contrastive_weight),
                              temperature=float(temperature))
    vmem = pl.BlockSpec(memory_space=pltpu.MemorySpace.VMEM)
    out = pl.pallas_call(
        kern2,
        out_shape=jax.ShapeDtypeStruct((1, 3), jnp.float32),
        in_specs=[vmem, vmem, vmem],
        out_specs=vmem,
    )(ctc_rows, v_avg, text_emb)
    return out[0, 0], out[0, 1], out[0, 2]


if __name__ == "__main__":
    key = jax.random.PRNGKey(0)
    B, T, V, H, L = 4, 8, 16, 32, 3      # batch, max_frames, num_glosses, hidden, max_tgt_len
    k1, k2, k3, k4 = jax.random.split(key, 4)

    # Native bf16 activations (the wrapper never up-casts the big tensors).
    logits = jax.random.normal(k1, (B, T, V), jnp.float32).astype(jnp.bfloat16)
    # gloss ids in [4, V) so they never collide with blank=3
    targets = jax.random.randint(k2, (B, L), 4, V, dtype=jnp.int32)
    target_lengths = jnp.array([3, 2, 3, 1], dtype=jnp.int32)
    visual_emb = jax.random.normal(k3, (B, T, H), jnp.float32).astype(jnp.bfloat16)
    text_emb = jax.random.normal(k4, (B, H), jnp.float32).astype(jnp.bfloat16)

    total, ctc_val, con_val = combined_loss(
        logits, targets, target_lengths, visual_emb, text_emb, input_lengths=None)
    jax.block_until_ready((total, ctc_val, con_val))
    print("KERNEL_OK")
</pallas_src>

<mosaic_0001>
module attributes {stable_mosaic.version = 11 : i64} {
  func.func @_ctc_pool_kernel(%arg0: i32, %arg1: i32, %arg2: memref<4x16x16xbf16, #tpu.memory_space<vmem>>, %arg3: memref<4x128xi32, #tpu.memory_space<vmem>>, %arg4: memref<4x128xi32, #tpu.memory_space<vmem>>, %arg5: memref<4x1xi32, #tpu.memory_space<vmem>>, %arg6: memref<4x1xi32, #tpu.memory_space<vmem>>, %arg7: memref<4x16x32xbf16, #tpu.memory_space<vmem>>, %arg8: memref<4x1xf32, #tpu.memory_space<vmem>>, %arg9: memref<4x32xf32, #tpu.memory_space<vmem>>, %arg10: memref<4x16x128xbf16, #tpu.memory_space<vmem>>, %arg11: memref<4x128xf32, #tpu.memory_space<vmem>>, %arg12: memref<4x128xf32, #tpu.memory_space<vmem>>, %arg13: memref<2x4x8x128xf32, #tpu.memory_space<vmem>>) attributes {dimension_semantics = [#tpu.dimension_semantics<parallel>, #tpu.dimension_semantics<arbitrary>], iteration_bounds = array<i64: 1, 1>, scalar_prefetch = 0 : i64, scratch_operands = 4 : i64, tpu.core_type = #tpu.core_type<tc>, window_params = [{transform_indices = @transform_0, window_bounds = array<i64: 4, 16, 16>}, {transform_indices = @transform_1, window_bounds = array<i64: 4, 128>}, {transform_indices = @transform_2, window_bounds = array<i64: 4, 128>}, {transform_indices = @transform_3, window_bounds = array<i64: 4, 1>}, {transform_indices = @transform_4, window_bounds = array<i64: 4, 1>}, {transform_indices = @transform_5, window_bounds = array<i64: 4, 16, 32>}, {transform_indices = @transform_6, window_bounds = array<i64: 4, 1>}, {transform_indices = @transform_7, window_bounds = array<i64: 4, 32>}]} {
    %c0 = arith.constant 0 : index
    %c0_0 = arith.constant 0 : index
    %c0_1 = arith.constant 0 : index
    %0 = vector.load %arg2[%c0, %c0_0, %c0_1] : memref<4x16x16xbf16, #tpu.memory_space<vmem>>, vector<4x16x16xbf16>
    %c0_i32 = arith.constant 0 : i32
    %1 = arith.cmpi eq, %arg1, %c0_i32 : i32
    %2 = arith.extui %1 : i1 to i32
    %c0_i32_2 = arith.constant 0 : i32
    %3 = arith.cmpi ne, %2, %c0_i32_2 : i32
    scf.if %3 {
      %c0_42 = arith.constant 0 : index
      %c0_43 = arith.constant 0 : index
      %54 = vector.load %arg3[%c0_42, %c0_43] : memref<4x128xi32, #tpu.memory_space<vmem>>, vector<4x128xi32>
      %55 = tpu.iota {dimensions = array<i32: 1>} : vector<4x16x128xi32>
      %56 = vector.shape_cast %54 : vector<4x128xi32> to vector<4x1x128xi32>
      %57 = vector.broadcast %56 : vector<4x1x128xi32> to vector<4x16x128xi32>
      %58 = arith.cmpi eq, %55, %57 : vector<4x16x128xi32>
      %59 = arith.extui %58 : vector<4x16x128xi1> to vector<4x16x128xi32>
      %60 = arith.sitofp %59 : vector<4x16x128xi32> to vector<4x16x128xf32>
      %61 = arith.truncf %60 : vector<4x16x128xf32> to vector<4x16x128xbf16>
      %c0_44 = arith.constant 0 : index
      %c0_45 = arith.constant 0 : index
      %c0_46 = arith.constant 0 : index
      %62 = vector.load %arg10[%c0_44, %c0_45, %c0_46] : memref<4x16x128xbf16, #tpu.memory_space<vmem>>, vector<4x16x128xbf16>
      tpu.vector_store %arg10[%c0_44, %c0_45, %c0_46], %61 {strides = array<i32>} : memref<4x16x128xbf16, #tpu.memory_space<vmem>>, vector<4x16x128xbf16>,
      %63 = tpu.iota {dimensions = array<i32: 1>} : vector<4x128xi32>
      %c0_i32_47 = arith.constant 0 : i32
      %64 = vector.broadcast %c0_i32_47 : i32 to vector<4x128xi32>
      %65 = arith.cmpi eq, %63, %64 : vector<4x128xi32>
      %cst_48 = arith.constant 0.000000e+00 : f32
      %cst_49 = arith.constant -1.000000e+09 : f32
      %66 = vector.broadcast %cst_48 : f32 to vector<4x128xf32>
      %67 = vector.broadcast %cst_49 : f32 to vector<4x128xf32>
      %68 = arith.select %65, %66, %67 : vector<4x128xi1>, vector<4x128xf32>
      %c0_50 = arith.constant 0 : index
      %c0_51 = arith.constant 0 : index
      %69 = vector.load %arg11[%c0_50, %c0_51] : memref<4x128xf32, #tpu.memory_space<vmem>>, vector<4x128xf32>
      tpu.vector_store %arg11[%c0_50, %c0_51], %68 {strides = array<i32>} : memref<4x128xf32, #tpu.memory_space<vmem>>, vector<4x128xf32>,
      %cst_52 = arith.constant -1.000000e+09 : f32
      %70 = vector.broadcast %cst_52 : f32 to vector<4x128xf32>
      %c0_53 = arith.constant 0 : index
      %c0_54 = arith.constant 0 : index
      %71 = vector.load %arg12[%c0_53, %c0_54] : memref<4x128xf32, #tpu.memory_space<vmem>>, vector<4x128xf32>
      tpu.vector_store %arg12[%c0_53, %c0_54], %70 {strides = array<i32>} : memref<4x128xf32, #tpu.memory_space<vmem>>, vector<4x128xf32>,
      %cst_55 = arith.constant 0.000000e+00 : f32
      %72 = vector.broadcast %cst_55 : f32 to vector<4x32xf32>
      %c0_56 = arith.constant 0 : index
      %c0_57 = arith.constant 0 : index
      %73 = vector.load %arg9[%c0_56, %c0_57] : memref<4x32xf32, #tpu.memory_space<vmem>>, vector<4x32xf32>
      tpu.vector_store %arg9[%c0_56, %c0_57], %72 {strides = array<i32>} : memref<4x32xf32, #tpu.memory_space<vmem>>, vector<4x32xf32>,
    } else {
    }
    %c0_3 = arith.constant 0 : index
    %c0_4 = arith.constant 0 : index
    %4 = vector.load %arg9[%c0_3, %c0_4] : memref<4x32xf32, #tpu.memory_space<vmem>>, vector<4x32xf32>
    %c0_5 = arith.constant 0 : index
    %c0_6 = arith.constant 0 : index
    %c0_7 = arith.constant 0 : index
    %5 = vector.load %arg7[%c0_5, %c0_6, %c0_7] : memref<4x16x32xbf16, #tpu.memory_space<vmem>>, vector<4x16x32xbf16>
    %6 = arith.extf %5 : vector<4x16x32xbf16> to vector<4x16x32xf32>
    %cst = arith.constant dense<0.000000e+00> : vector<4x32xf32>
    %7 = vector.multi_reduction <add>, %6, %cst [1] : vector<4x16x32xf32> to vector<4x32xf32>
    %8 = arith.addf %4, %7 : vector<4x32xf32>
    %c0_8 = arith.constant 0 : index
    %c0_9 = arith.constant 0 : index
    %9 = vector.load %arg9[%c0_8, %c0_9] : memref<4x32xf32, #tpu.memory_space<vmem>>, vector<4x32xf32>
    tpu.vector_store %arg9[%c0_8, %c0_9], %8 {strides = array<i32>} : memref<4x32xf32, #tpu.memory_space<vmem>>, vector<4x32xf32>,
    %10 = arith.extf %0 : vector<4x16x16xbf16> to vector<4x16x16xf32>
    %cst_10 = arith.constant dense<0xFF800000> : vector<4x16xf32>
    %11 = vector.multi_reduction <maximumf>, %10, %cst_10 [2] : vector<4x16x16xf32> to vector<4x16xf32>
    %12 = vector.shape_cast %11 : vector<4x16xf32> to vector<4x16x1xf32>
    %13 = vector.broadcast %12 : vector<4x16x1xf32> to vector<4x16x16xf32>
    %14 = arith.subf %10, %13 : vector<4x16x16xf32>
    %15 = math.exp %14 : vector<4x16x16xf32>
    %cst_11 = arith.constant dense<0.000000e+00> : vector<4x16xf32>
    %16 = vector.multi_reduction <add>, %15, %cst_11 [2] : vector<4x16x16xf32> to vector<4x16xf32>
    %17 = vector.shape_cast %16 : vector<4x16xf32> to vector<4x16x1xf32>
    %18 = math.log %17 : vector<4x16x1xf32>
    %19 = arith.addf %12, %18 : vector<4x16x1xf32>
    %c0_12 = arith.constant 0 : index
    %c0_13 = arith.constant 0 : index
    %c0_14 = arith.constant 0 : index
    %20 = vector.load %arg10[%c0_12, %c0_13, %c0_14] : memref<4x16x128xbf16, #tpu.memory_space<vmem>>, vector<4x16x128xbf16>
    %cst_15 = arith.constant dense<0.000000e+00> : vector<4x16x128xf32>
    %21 = tpu.matmul %0, %20, %cst_15 {dimension_numbers = #tpu.dot_dimension_numbers<[2], [1], [1], [2], [0, 0, 0, 1, 1, 2], [0], [0]>} : vector<4x16x16xbf16>, vector<4x16x128xbf16>, vector<4x16x128xf32> -> vector<4x16x128xf32>
    %22 = tpu.iota {dimensions = array<i32: 2>} : vector<4x16x128xi32>
    %c3_i32 = arith.constant 3 : i32
    %23 = vector.broadcast %c3_i32 : i32 to vector<4x16x128xi32>
    %24 = arith.cmpi sle, %22, %23 : vector<4x16x128xi32>
    %25 = vector.broadcast %19 : vector<4x16x1xf32> to vector<4x16x128xf32>
    %26 = arith.subf %21, %25 : vector<4x16x128xf32>
    %cst_16 = arith.constant -1.000000e+09 : f32
    %27 = vector.broadcast %cst_16 : f32 to vector<4x16x128xf32>
    %28 = arith.select %24, %26, %27 : vector<4x16x128xi1>, vector<4x16x128xf32>
    %29 = vector.extract_strided_slice %28 {offsets = [0, 0, 0], sizes = [4, 8, 128], strides = [1, 1, 1]} : vector<4x16x128xf32> to vector<4x8x128xf32>
    %c0_17 = arith.constant 0 : index
    %c0_18 = arith.constant 0 : index
    %c0_19 = arith.constant 0 : index
    %c0_20 = arith.constant 0 : index
    %30 = vector.load %arg13[%c0_17, %c0_18, %c0_19, %c0_20] : memref<2x4x8x128xf32, #tpu.memory_space<vmem>>, vector<1x4x8x128xf32>
    %31 = vector.shape_cast %30 : vector<1x4x8x128xf32> to vector<4x8x128xf32>
    %32 = vector.shape_cast %29 : vector<4x8x128xf32> to vector<1x4x8x128xf32>
    tpu.vector_store %arg13[%c0_17, %c0_18, %c0_19, %c0_20], %32 {strides = array<i32>} : memref<2x4x8x128xf32, #tpu.memory_space<vmem>>, vector<1x4x8x128xf32>,
    %33 = vector.extract_strided_slice %28 {offsets = [0, 8, 0], sizes = [4, 8, 128], strides = [1, 1, 1]} : vector<4x16x128xf32> to vector<4x8x128xf32>
    %c1 = arith.constant 1 : index
    %c0_21 = arith.constant 0 : index
    %c0_22 = arith.constant 0 : index
    %c0_23 = arith.constant 0 : index
    %34 = vector.load %arg13[%c1, %c0_21, %c0_22, %c0_23] : memref<2x4x8x128xf32, #tpu.memory_space<vmem>>, vector<1x4x8x128xf32>
    %35 = vector.shape_cast %34 : vector<1x4x8x128xf32> to vector<4x8x128xf32>
    %36 = vector.shape_cast %33 : vector<4x8x128xf32> to vector<1x4x8x128xf32>
    tpu.vector_store %arg13[%c1, %c0_21, %c0_22, %c0_23], %36 {strides = array<i32>} : memref<2x4x8x128xf32, #tpu.memory_space<vmem>>, vector<1x4x8x128xf32>,
    %c0_24 = arith.constant 0 : index
    %c0_25 = arith.constant 0 : index
    %37 = vector.load %arg4[%c0_24, %c0_25] : memref<4x128xi32, #tpu.memory_space<vmem>>, vector<4x128xi32>
    %c0_i32_26 = arith.constant 0 : i32
    %38 = vector.broadcast %c0_i32_26 : i32 to vector<4x128xi32>
    %39 = arith.cmpi ne, %37, %38 : vector<4x128xi32>
    %c0_27 = arith.constant 0 : index
    %c0_28 = arith.constant 0 : index
    %40 = vector.load %arg5[%c0_27, %c0_28] : memref<4x1xi32, #tpu.memory_space<vmem>>, vector<4x1xi32>
    %41 = tpu.iota {dimensions = array<i32: 1>} : vector<4x128xi32>
    %c1_i32 = arith.constant 1 : i32
    %42 = vector.broadcast %c1_i32 : i32 to vector<4x128xi32>
    %43 = arith.cmpi sge, %41, %42 : vector<4x128xi32>
    %c16_i32 = arith.constant 16 : i32
    %44 = arith.muli %arg1, %c16_i32 : i32
    %c0_29 = arith.constant 0 : index
    %c0_30 = arith.constant 0 : index
    %45 = vector.load %arg11[%c0_29, %c0_30] : memref<4x128xf32, #tpu.memory_space<vmem>>, vector<4x128xf32>
    %c0_31 = arith.constant 0 : index
    %c0_32 = arith.constant 0 : index
    %46 = vector.load %arg12[%c0_31, %c0_32] : memref<4x128xf32, #tpu.memory_space<vmem>>, vector<4x128xf32>
    %c0_i32_33 = arith.constant 0 : i32
    %c2_i32 = arith.constant 2 : i32
    %47 = arith.addi %c0_i32_33, %c2_i32 : i32
    %c1_i32_34 = arith.constant 1 : i32
    %48:2 = scf.for %arg14 = %c0_i32_33 to %47 step %c1_i32_34 iter_args(%arg15 = %45, %arg16 = %46) -> (vector<4x128xf32>, vector<4x128xf32>)  : i32 {
      %54 = arith.index_cast %arg14 : i32 to index
      %c0_42 = arith.constant 0 : index
      %c0_43 = arith.constant 0 : index
      %c0_44 = arith.constant 0 : index
      %55 = vector.load %arg13[%54, %c0_42, %c0_43, %c0_44] : memref<2x4x8x128xf32, #tpu.memory_space<vmem>>, vector<1x4x8x128xf32>
      %56 = vector.shape_cast %55 : vector<1x4x8x128xf32> to vector<4x8x128xf32>
      %57 = vector.extract_strided_slice %56 {offsets = [0, 0, 0], sizes = [4, 1, 128], strides = [1, 1, 1]} : vector<4x8x128xf32> to vector<4x1x128xf32>
      %58 = vector.shape_cast %57 : vector<4x1x128xf32> to vector<4x128xf32>
      %59 = vector.extract_strided_slice %58 {offsets = [0, 3], sizes = [4, 1], strides = [1, 1]} : vector<4x128xf32> to vector<4x1xf32>
      %c1_i32_45 = arith.constant 1 : i32
      %60 = tpu.dynamic_rotate %arg16 by %c1_i32_45 dim 1 : vector<4x128xf32>, i32 -> vector<4x128xf32>
      %cst_46 = arith.constant -1.000000e+09 : f32
      %61 = vector.broadcast %cst_46 : f32 to vector<4x128xf32>
      %62 = arith.select %43, %60, %61 : vector<4x128xi1>, vector<4x128xf32>
      %63 = arith.subf %arg15, %62 : vector<4x128xf32>
      %64 = math.absf %63 : vector<4x128xf32>
      %65 = arith.maximumf %arg15, %62 : vector<4x128xf32>
      %cst_47 = arith.constant 0.000000e+00 : f32
      %66 = vector.broadcast %cst_47 : f32 to vector<4x128xf32>
      %67 = arith.subf %66, %64 : vector<4x128xf32>
      %68 = math.exp %67 : vector<4x128xf32>
      %cst_48 = arith.constant 1.000000e+00 : f32
      %69 = vector.broadcast %cst_48 : f32 to vector<4x128xf32>
      %70 = arith.addf %69, %68 : vector<4x128xf32>
      %71 = math.log %70 : vector<4x128xf32>
      %72 = arith.addf %65, %71 : vector<4x128xf32>
      %73 = vector.broadcast %59 : vector<4x1xf32> to vector<4x128xf32>
      %74 = arith.addf %72, %73 : vector<4x128xf32>
      %cst_49 = arith.constant -1.000000e+09 : f32
      %75 = vector.broadcast %cst_49 : f32 to vector<4x128xf32>
      %76 = arith.select %39, %62, %75 : vector<4x128xi1>, vector<4x128xf32>
      %77 = arith.maximumf %arg16, %arg15 : vector<4x128xf32>
      %78 = arith.maximumf %77, %76 : vector<4x128xf32>
      %79 = arith.subf %arg16, %78 : vector<4x128xf32>
      %80 = math.exp %79 : vector<4x128xf32>
      %81 = arith.subf %arg15, %78 : vector<4x128xf32>
      %82 = math.exp %81 : vector<4x128xf32>
      %83 = arith.addf %80, %82 : vector<4x128xf32>
      %84 = arith.subf %76, %78 : vector<4x128xf32>
      %85 = math.exp %84 : vector<4x128xf32>
      %86 = arith.addf %83, %85 : vector<4x128xf32>
      %87 = math.log %86 : vector<4x128xf32>
      %88 = arith.addf %78, %87 : vector<4x128xf32>
      %89 = arith.addf %88, %58 : vector<4x128xf32>
      %c8_i32 = arith.constant 8 : i32
      %90 = arith.muli %arg14, %c8_i32 : i32
      %91 = arith.addi %44, %90 : i32
      %c0_i32_50 = arith.constant 0 : i32
      %92 = arith.addi %91, %c0_i32_50 : i32
      %93 = vector.broadcast %92 : i32 to vector<4x1xi32>
      %94 = arith.cmpi slt, %93, %40 : vector<4x1xi32>
      %95 = vector.shape_cast %94 : vector<4x1xi1> to vector<4x1xi1>
      %96 = vector.broadcast %95 : vector<4x1xi1> to vector<4x128xi1>
      %97 = arith.select %96, %74, %arg15 : vector<4x128xi1>, vector<4x128xf32>
      %98 = vector.shape_cast %94 : vector<4x1xi1> to vector<4x1xi1>
      %99 = vector.broadcast %98 : vector<4x1xi1> to vector<4x128xi1>
      %100 = arith.select %99, %89, %arg16 : vector<4x128xi1>, vector<4x128xf32>
      %101 = vector.extract_strided_slice %56 {offsets = [0, 1, 0], sizes = [4, 1, 128], strides = [1, 1, 1]} : vector<4x8x128xf32> to vector<4x1x128xf32>
      %102 = vector.shape_cast %101 : vector<4x1x128xf32> to vector<4x128xf32>
      %103 = vector.extract_strided_slice %102 {offsets = [0, 3], sizes = [4, 1], strides = [1, 1]} : vector<4x128xf32> to vector<4x1xf32>
      %c1_i32_51 = arith.constant 1 : i32
      %104 = tpu.dynamic_rotate %100 by %c1_i32_51 dim 1 : vector<4x128xf32>, i32 -> vector<4x128xf32>
      %cst_52 = arith.constant -1.000000e+09 : f32
      %105 = vector.broadcast %cst_52 : f32 to vector<4x128xf32>
      %106 = arith.select %43, %104, %105 : vector<4x128xi1>, vector<4x128xf32>
      %107 = arith.subf %97, %106 : vector<4x128xf32>
      %108 = math.absf %107 : vector<4x128xf32>
      %109 = arith.maximumf %97, %106 : vector<4x128xf32>
      %cst_53 = arith.constant 0.000000e+00 : f32
      %110 = vector.broadcast %cst_53 : f32 to vector<4x128xf32>
      %111 = arith.subf %110, %108 : vector<4x128xf32>
      %112 = math.exp %111 : vector<4x128xf32>
      %cst_54 = arith.constant 1.000000e+00 : f32
      %113 = vector.broadcast %cst_54 : f32 to vector<4x128xf32>
      %114 = arith.addf %113, %112 : vector<4x128xf32>
      %115 = math.log %114 : vector<4x128xf32>
      %116 = arith.addf %109, %115 : vector<4x128xf32>
      %117 = vector.broadcast %103 : vector<4x1xf32> to vector<4x128xf32>
      %118 = arith.addf %116, %117 : vector<4x128xf32>
      %cst_55 = arith.constant -1.000000e+09 : f32
      %119 = vector.broadcast %cst_55 : f32 to vector<4x128xf32>
      %120 = arith.select %39, %106, %119 : vector<4x128xi1>, vector<4x128xf32>
      %121 = arith.maximumf %100, %97 : vector<4x128xf32>
      %122 = arith.maximumf %121, %120 : vector<4x128xf32>
      %123 = arith.subf %100, %122 : vector<4x128xf32>
      %124 = math.exp %123 : vector<4x128xf32>
      %125 = arith.subf %97, %122 : vector<4x128xf32>
      %126 = math.exp %125 : vector<4x128xf32>
      %127 = arith.addf %124, %126 : vector<4x128xf32>
      %128 = arith.subf %120, %122 : vector<4x128xf32>
      %129 = math.exp %128 : vector<4x128xf32>
      %130 = arith.addf %127, %129 : vector<4x128xf32>
      %131 = math.log %130 : vector<4x128xf32>
      %132 = arith.addf %122, %131 : vector<4x128xf32>
      %133 = arith.addf %132, %102 : vector<4x128xf32>
      %c8_i32_56 = arith.constant 8 : i32
      %134 = arith.muli %arg14, %c8_i32_56 : i32
      %135 = arith.addi %44, %134 : i32
      %c1_i32_57 = arith.constant 1 : i32
      %136 = arith.addi %135, %c1_i32_57 : i32
      %137 = vector.broadcast %136 : i32 to vector<4x1xi32>
      %138 = arith.cmpi slt, %137, %40 : vector<4x1xi32>
      %139 = vector.shape_cast %138 : vector<4x1xi1> to vector<4x1xi1>
      %140 = vector.broadcast %139 : vector<4x1xi1> to vector<4x128xi1>
      %141 = arith.select %140, %118, %97 : vector<4x128xi1>, vector<4x128xf32>
      %142 = vector.shape_cast %138 : vector<4x1xi1> to vector<4x1xi1>
      %143 = vector.broadcast %142 : vector<4x1xi1> to vector<4x128xi1>
      %144 = arith.select %143, %133, %100 : vector<4x128xi1>, vector<4x128xf32>
      %145 = vector.extract_strided_slice %56 {offsets = [0, 2, 0], sizes = [4, 1, 128], strides = [1, 1, 1]} : vector<4x8x128xf32> to vector<4x1x128xf32>
      %146 = vector.shape_cast %145 : vector<4x1x128xf32> to vector<4x128xf32>
      %147 = vector.extract_strided_slice %146 {offsets = [0, 3], sizes = [4, 1], strides = [1, 1]} : vector<4x128xf32> to vector<4x1xf32>
      %c1_i32_58 = arith.constant 1 : i32
      %148 = tpu.dynamic_rotate %144 by %c1_i32_58 dim 1 : vector<4x128xf32>, i32 -> vector<4x128xf32>
      %cst_59 = arith.constant -1.000000e+09 : f32
      %149 = vector.broadcast %cst_59 : f32 to vector<4x128xf32>
      %150 = arith.select %43, %148, %149 : vector<4x128xi1>, vector<4x128xf32>
      %151 = arith.subf %141, %150 : vector<4x128xf32>
      %152 = math.absf %151 : vector<4x128xf32>
      %153 = arith.maximumf %141, %150 : vector<4x128xf32>
      %cst_60 = arith.constant 0.000000e+00 : f32
      %154 = vector.broadcast %cst_60 : f32 to vector<4x128xf32>
      %155 = arith.subf %154, %152 : vector<4x128xf32>
      %156 = math.exp %155 : vector<4x128xf32>
      %cst_61 = arith.constant 1.000000e+00 : f32
      %157 = vector.broadcast %cst_61 : f32 to vector<4x128xf32>
      %158 = arith.addf %157, %156 : vector<4x128xf32>
      %159 = math.log %158 : vector<4x128xf32>
      %160 = arith.addf %153, %159 : vector<4x128xf32>
      %161 = vector.broadcast %147 : vector<4x1xf32> to vector<4x128xf32>
      %162 = arith.addf %160, %161 : vector<4x128xf32>
      %cst_62 = arith.constant -1.000000e+09 : f32
      %163 = vector.broadcast %cst_62 : f32 to vector<4x128xf32>
      %164 = arith.select %39, %150, %163 : vector<4x128xi1>, vector<4x128xf32>
      %165 = arith.maximumf %144, %141 : vector<4x128xf32>
      %166 = arith.maximumf %165, %164 : vector<4x128xf32>
      %167 = arith.subf %144, %166 : vector<4x128xf32>
      %168 = math.exp %167 : vector<4x128xf32>
      %169 = arith.subf %141, %166 : vector<4x128xf32>
      %170 = math.exp %169 : vector<4x128xf32>
      %171 = arith.addf %168, %170 : vector<4x128xf32>
      %172 = arith.subf %164, %166 : vector<4x128xf32>
      %173 = math.exp %172 : vector<4x128xf32>
      %174 = arith.addf %171, %173 : vector<4x128xf32>
      %175 = math.log %174 : vector<4x128xf32>
      %176 = arith.addf %166, %175 : vector<4x128xf32>
      %177 = arith.addf %176, %146 : vector<4x128xf32>
      %c8_i32_63 = arith.constant 8 : i32
      %178 = arith.muli %arg14, %c8_i32_63 : i32
      %179 = arith.addi %44, %178 : i32
      %c2_i32_64 = arith.constant 2 : i32
      %180 = arith.addi %179, %c2_i32_64 : i32
      %181 = vector.broadcast %180 : i32 to vector<4x1xi32>
      %182 = arith.cmpi slt, %181, %40 : vector<4x1xi32>
      %183 = vector.shape_cast %182 : vector<4x1xi1> to vector<4x1xi1>
      %184 = vector.broadcast %183 : vector<4x1xi1> to vector<4x128xi1>
      %185 = arith.select %184, %162, %141 : vector<4x128xi1>, vector<4x128xf32>
      %186 = vector.shape_cast %182 : vector<4x1xi1> to vector<4x1xi1>
      %187 = vector.broadcast %186 : vector<4x1xi1> to vector<4x128xi1>
      %188 = arith.select %187, %177, %144 : vector<4x128xi1>, vector<4x128xf32>
      %189 = vector.extract_strided_slice %56 {offsets = [0, 3, 0], sizes = [4, 1, 128], strides = [1, 1, 1]} : vector<4x8x128xf32> to vector<4x1x128xf32>
      %190 = vector.shape_cast %189 : vector<4x1x128xf32> to vector<4x128xf32>
      %191 = vector.extract_strided_slice %190 {offsets = [0, 3], sizes = [4, 1], strides = [1, 1]} : vector<4x128xf32> to vector<4x1xf32>
      %c1_i32_65 = arith.constant 1 : i32
      %192 = tpu.dynamic_rotate %188 by %c1_i32_65 dim 1 : vector<4x128xf32>, i32 -> vector<4x128xf32>
      %cst_66 = arith.constant -1.000000e+09 : f32
      %193 = vector.broadcast %cst_66 : f32 to vector<4x128xf32>
      %194 = arith.select %43, %192, %193 : vector<4x128xi1>, vector<4x128xf32>
      %195 = arith.subf %185, %194 : vector<4x128xf32>
      %196 = math.absf %195 : vector<4x128xf32>
      %197 = arith.maximumf %185, %194 : vector<4x128xf32>
      %cst_67 = arith.constant 0.000000e+00 : f32
      %198 = vector.broadcast %cst_67 : f32 to vector<4x128xf32>
      %199 = arith.subf %198, %196 : vector<4x128xf32>
      %200 = math.exp %199 : vector<4x128xf32>
      %cst_68 = arith.constant 1.000000e+00 : f32
      %201 = vector.broadcast %cst_68 : f32 to vector<4x128xf32>
      %202 = arith.addf %201, %200 : vector<4x128xf32>
      %203 = math.log %202 : vector<4x128xf32>
      %204 = arith.addf %197, %203 : vector<4x128xf32>
      %205 = vector.broadcast %191 : vector<4x1xf32> to vector<4x128xf32>
      %206 = arith.addf %204, %205 : vector<4x128xf32>
      %cst_69 = arith.constant -1.000000e+09 : f32
      %207 = vector.broadcast %cst_69 : f32 to vector<4x128xf32>
      %208 = arith.select %39, %194, %207 : vector<4x128xi1>, vector<4x128xf32>
      %209 = arith.maximumf %188, %185 : vector<4x128xf32>
      %210 = arith.maximumf %209, %208 : vector<4x128xf32>
      %211 = arith.subf %188, %210 : vector<4x128xf32>
      %212 = math.exp %211 : vector<4x128xf32>
      %213 = arith.subf %185, %210 : vector<4x128xf32>
      %214 = math.exp %213 : vector<4x128xf32>
      %215 = arith.addf %212, %214 : vector<4x128xf32>
      %216 = arith.subf %208, %210 : vector<4x128xf32>
      %217 = math.exp %216 : vector<4x128xf32>
      %218 = arith.addf %215, %217 : vector<4x128xf32>
      %219 = math.log %218 : vector<4x128xf32>
      %220 = arith.addf %210, %219 : vector<4x128xf32>
      %221 = arith.addf %220, %190 : vector<4x128xf32>
      %c8_i32_70 = arith.constant 8 : i32
      %222 = arith.muli %arg14, %c8_i32_70 : i32
      %223 = arith.addi %44, %222 : i32
      %c3_i32_71 = arith.constant 3 : i32
      %224 = arith.addi %223, %c3_i32_71 : i32
      %225 = vector.broadcast %224 : i32 to vector<4x1xi32>
      %226 = arith.cmpi slt, %225, %40 : vector<4x1xi32>
      %227 = vector.shape_cast %226 : vector<4x1xi1> to vector<4x1xi1>
      %228 = vector.broadcast %227 : vector<4x1xi1> to vector<4x128xi1>
      %229 = arith.select %228, %206, %185 : vector<4x128xi1>, vector<4x128xf32>
      %230 = vector.shape_cast %226 : vector<4x1xi1> to vector<4x1xi1>
      %231 = vector.broadcast %230 : vector<4x1xi1> to vector<4x128xi1>
      %232 = arith.select %231, %221, %188 : vector<4x128xi1>, vector<4x128xf32>
      %233 = vector.extract_strided_slice %56 {offsets = [0, 4, 0], sizes = [4, 1, 128], strides = [1, 1, 1]} : vector<4x8x128xf32> to vector<4x1x128xf32>
      %234 = vector.shape_cast %233 : vector<4x1x128xf32> to vector<4x128xf32>
      %235 = vector.extract_strided_slice %234 {offsets = [0, 3], sizes = [4, 1], strides = [1, 1]} : vector<4x128xf32> to vector<4x1xf32>
      %c1_i32_72 = arith.constant 1 : i32
      %236 = tpu.dynamic_rotate %232 by %c1_i32_72 dim 1 : vector<4x128xf32>, i32 -> vector<4x128xf32>
      %cst_73 = arith.constant -1.000000e+09 : f32
      %237 = vector.broadcast %cst_73 : f32 to vector<4x128xf32>
      %238 = arith.select %43, %236, %237 : vector<4x128xi1>, vector<4x128xf32>
      %239 = arith.subf %229, %238 : vector<4x128xf32>
      %240 = math.absf %239 : vector<4x128xf32>
      %241 = arith.maximumf %229, %238 : vector<4x128xf32>
      %cst_74 = arith.constant 0.000000e+00 : f32
      %242 = vector.broadcast %cst_74 : f32 to vector<4x128xf32>
      %243 = arith.subf %242, %240 : vector<4x128xf32>
      %244 = math.exp %243 : vector<4x128xf32>
      %cst_75 = arith.constant 1.000000e+00 : f32
      %245 = vector.broadcast %cst_75 : f32 to vector<4x128xf32>
      %246 = arith.addf %245, %244 : vector<4x128xf32>
      %247 = math.log %246 : vector<4x128xf32>
      %248 = arith.addf %241, %247 : vector<4x128xf32>
      %249 = vector.broadcast %235 : vector<4x1xf32> to vector<4x128xf32>
      %250 = arith.addf %248, %249 : vector<4x128xf32>
      %cst_76 = arith.constant -1.000000e+09 : f32
      %251 = vector.broadcast %cst_76 : f32 to vector<4x128xf32>
      %252 = arith.select %39, %238, %251 : vector<4x128xi1>, vector<4x128xf32>
      %253 = arith.maximumf %232, %229 : vector<4x128xf32>
      %254 = arith.maximumf %253, %252 : vector<4x128xf32>
      %255 = arith.subf %232, %254 : vector<4x128xf32>
      %256 = math.exp %255 : vector<4x128xf32>
      %257 = arith.subf %229, %254 : vector<4x128xf32>
      %258 = math.exp %257 : vector<4x128xf32>
      %259 = arith.addf %256, %258 : vector<4x128xf32>
      %260 = arith.subf %252, %254 : vector<4x128xf32>
      %261 = math.exp %260 : vector<4x128xf32>
      %262 = arith.addf %259, %261 : vector<4x128xf32>
      %263 = math.log %262 : vector<4x128xf32>
      %264 = arith.addf %254, %263 : vector<4x128xf32>
      %265 = arith.addf %264, %234 : vector<4x128xf32>
      %c8_i32_77 = arith.constant 8 : i32
      %266 = arith.muli %arg14, %c8_i32_77 : i32
      %267 = arith.addi %44, %266 : i32
      %c4_i32 = arith.constant 4 : i32
      %268 = arith.addi %267, %c4_i32 : i32
      %269 = vector.broadcast %268 : i32 to vector<4x1xi32>
      %270 = arith.cmpi slt, %269, %40 : vector<4x1xi32>
      %271 = vector.shape_cast %270 : vector<4x1xi1> to vector<4x1xi1>
      %272 = vector.broadcast %271 : vector<4x1xi1> to vector<4x128xi1>
      %273 = arith.select %272, %250, %229 : vector<4x128xi1>, vector<4x128xf32>
      %274 = vector.shape_cast %270 : vector<4x1xi1> to vector<4x1xi1>
      %275 = vector.broadcast %274 : vector<4x1xi1> to vector<4x128xi1>
      %276 = arith.select %275, %265, %232 : vector<4x128xi1>, vector<4x128xf32>
      %277 = vector.extract_strided_slice %56 {offsets = [0, 5, 0], sizes = [4, 1, 128], strides = [1, 1, 1]} : vector<4x8x128xf32> to vector<4x1x128xf32>
      %278 = vector.shape_cast %277 : vector<4x1x128xf32> to vector<4x128xf32>
      %279 = vector.extract_strided_slice %278 {offsets = [0, 3], sizes = [4, 1], strides = [1, 1]} : vector<4x128xf32> to vector<4x1xf32>
      %c1_i32_78 = arith.constant 1 : i32
      %280 = tpu.dynamic_rotate %276 by %c1_i32_78 dim 1 : vector<4x128xf32>, i32 -> vector<4x128xf32>
      %cst_79 = arith.constant -1.000000e+09 : f32
      %281 = vector.broadcast %cst_79 : f32 to vector<4x128xf32>
      %282 = arith.select %43, %280, %281 : vector<4x128xi1>, vector<4x128xf32>
      %283 = arith.subf %273, %282 : vector<4x128xf32>
      %284 = math.absf %283 : vector<4x128xf32>
      %285 = arith.maximumf %273, %282 : vector<4x128xf32>
      %cst_80 = arith.constant 0.000000e+00 : f32
      %286 = vector.broadcast %cst_80 : f32 to vector<4x128xf32>
      %287 = arith.subf %286, %284 : vector<4x128xf32>
      %288 = math.exp %287 : vector<4x128xf32>
      %cst_81 = arith.constant 1.000000e+00 : f32
      %289 = vector.broadcast %cst_81 : f32 to vector<4x128xf32>
      %290 = arith.addf %289, %288 : vector<4x128xf32>
      %291 = math.log %290 : vector<4x128xf32>
      %292 = arith.addf %285, %291 : vector<4x128xf32>
      %293 = vector.broadcast %279 : vector<4x1xf32> to vector<4x128xf32>
      %294 = arith.addf %292, %293 : vector<4x128xf32>
      %cst_82 = arith.constant -1.000000e+09 : f32
      %295 = vector.broadcast %cst_82 : f32 to vector<4x128xf32>
      %296 = arith.select %39, %282, %295 : vector<4x128xi1>, vector<4x128xf32>
      %297 = arith.maximumf %276, %273 : vector<4x128xf32>
      %298 = arith.maximumf %297, %296 : vector<4x128xf32>
      %299 = arith.subf %276, %298 : vector<4x128xf32>
      %300 = math.exp %299 : vector<4x128xf32>
      %301 = arith.subf %273, %298 : vector<4x128xf32>
      %302 = math.exp %301 : vector<4x128xf32>
      %303 = arith.addf %300, %302 : vector<4x128xf32>
      %304 = arith.subf %296, %298 : vector<4x128xf32>
      %305 = math.exp %304 : vector<4x128xf32>
      %306 = arith.addf %303, %305 : vector<4x128xf32>
      %307 = math.log %306 : vector<4x128xf32>
      %308 = arith.addf %298, %307 : vector<4x128xf32>
      %309 = arith.addf %308, %278 : vector<4x128xf32>
      %c8_i32_83 = arith.constant 8 : i32
      %310 = arith.muli %arg14, %c8_i32_83 : i32
      %311 = arith.addi %44, %310 : i32
      %c5_i32 = arith.constant 5 : i32
      %312 = arith.addi %311, %c5_i32 : i32
      %313 = vector.broadcast %312 : i32 to vector<4x1xi32>
      %314 = arith.cmpi slt, %313, %40 : vector<4x1xi32>
      %315 = vector.shape_cast %314 : vector<4x1xi1> to vector<4x1xi1>
      %316 = vector.broadcast %315 : vector<4x1xi1> to vector<4x128xi1>
      %317 = arith.select %316, %294, %273 : vector<4x128xi1>, vector<4x128xf32>
      %318 = vector.shape_cast %314 : vector<4x1xi1> to vector<4x1xi1>
      %319 = vector.broadcast %318 : vector<4x1xi1> to vector<4x128xi1>
      %320 = arith.select %319, %309, %276 : vector<4x128xi1>, vector<4x128xf32>
      %321 = vector.extract_strided_slice %56 {offsets = [0, 6, 0], sizes = [4, 1, 128], strides = [1, 1, 1]} : vector<4x8x128xf32> to vector<4x1x128xf32>
      %322 = vector.shape_cast %321 : vector<4x1x128xf32> to vector<4x128xf32>
      %323 = vector.extract_strided_slice %322 {offsets = [0, 3], sizes = [4, 1], strides = [1, 1]} : vector<4x128xf32> to vector<4x1xf32>
      %c1_i32_84 = arith.constant 1 : i32
      %324 = tpu.dynamic_rotate %320 by %c1_i32_84 dim 1 : vector<4x128xf32>, i32 -> vector<4x128xf32>
      %cst_85 = arith.constant -1.000000e+09 : f32
      %325 = vector.broadcast %cst_85 : f32 to vector<4x128xf32>
      %326 = arith.select %43, %324, %325 : vector<4x128xi1>, vector<4x128xf32>
      %327 = arith.subf %317, %326 : vector<4x128xf32>
      %328 = math.absf %327 : vector<4x128xf32>
      %329 = arith.maximumf %317, %326 : vector<4x128xf32>
      %cst_86 = arith.constant 0.000000e+00 : f32
      %330 = vector.broadcast %cst_86 : f32 to vector<4x128xf32>
      %331 = arith.subf %330, %328 : vector<4x128xf32>
      %332 = math.exp %331 : vector<4x128xf32>
      %cst_87 = arith.constant 1.000000e+00 : f32
      %333 = vector.broadcast %cst_87 : f32 to vector<4x128xf32>
      %334 = arith.addf %333, %332 : vector<4x128xf32>
      %335 = math.log %334 : vector<4x128xf32>
      %336 = arith.addf %329, %335 : vector<4x128xf32>
      %337 = vector.broadcast %323 : vector<4x1xf32> to vector<4x128xf32>
      %338 = arith.addf %336, %337 : vector<4x128xf32>
      %cst_88 = arith.constant -1.000000e+09 : f32
      %339 = vector.broadcast %cst_88 : f32 to vector<4x128xf32>
      %340 = arith.select %39, %326, %339 : vector<4x128xi1>, vector<4x128xf32>
      %341 = arith.maximumf %320, %317 : vector<4x128xf32>
      %342 = arith.maximumf %341, %340 : vector<4x128xf32>
      %343 = arith.subf %320, %342 : vector<4x128xf32>
      %344 = math.exp %343 : vector<4x128xf32>
      %345 = arith.subf %317, %342 : vector<4x128xf32>
      %346 = math.exp %345 : vector<4x128xf32>
      %347 = arith.addf %344, %346 : vector<4x128xf32>
      %348 = arith.subf %340, %342 : vector<4x128xf32>
      %349 = math.exp %348 : vector<4x128xf32>
      %350 = arith.addf %347, %349 : vector<4x128xf32>
      %351 = math.log %350 : vector<4x128xf32>
      %352 = arith.addf %342, %351 : vector<4x128xf32>
      %353 = arith.addf %352, %322 : vector<4x128xf32>
      %c8_i32_89 = arith.constant 8 : i32
      %354 = arith.muli %arg14, %c8_i32_89 : i32
      %355 = arith.addi %44, %354 : i32
      %c6_i32 = arith.constant 6 : i32
      %356 = arith.addi %355, %c6_i32 : i32
      %357 = vector.broadcast %356 : i32 to vector<4x1xi32>
      %358 = arith.cmpi slt, %357, %40 : vector<4x1xi32>
      %359 = vector.shape_cast %358 : vector<4x1xi1> to vector<4x1xi1>
      %360 = vector.broadcast %359 : vector<4x1xi1> to vector<4x128xi1>
      %361 = arith.select %360, %338, %317 : vector<4x128xi1>, vector<4x128xf32>
      %362 = vector.shape_cast %358 : vector<4x1xi1> to vector<4x1xi1>
      %363 = vector.broadcast %362 : vector<4x1xi1> to vector<4x128xi1>
      %364 = arith.select %363, %353, %320 : vector<4x128xi1>, vector<4x128xf32>
      %365 = vector.extract_strided_slice %56 {offsets = [0, 7, 0], sizes = [4, 1, 128], strides = [1, 1, 1]} : vector<4x8x128xf32> to vector<4x1x128xf32>
      %366 = vector.shape_cast %365 : vector<4x1x128xf32> to vector<4x128xf32>
      %367 = vector.extract_strided_slice %366 {offsets = [0, 3], sizes = [4, 1], strides = [1, 1]} : vector<4x128xf32> to vector<4x1xf32>
      %c1_i32_90 = arith.constant 1 : i32
      %368 = tpu.dynamic_rotate %364 by %c1_i32_90 dim 1 : vector<4x128xf32>, i32 -> vector<4x128xf32>
      %cst_91 = arith.constant -1.000000e+09 : f32
      %369 = vector.broadcast %cst_91 : f32 to vector<4x128xf32>
      %370 = arith.select %43, %368, %369 : vector<4x128xi1>, vector<4x128xf32>
      %371 = arith.subf %361, %370 : vector<4x128xf32>
      %372 = math.absf %371 : vector<4x128xf32>
      %373 = arith.maximumf %361, %370 : vector<4x128xf32>
      %cst_92 = arith.constant 0.000000e+00 : f32
      %374 = vector.broadcast %cst_92 : f32 to vector<4x128xf32>
      %375 = arith.subf %374, %372 : vector<4x128xf32>
      %376 = math.exp %375 : vector<4x128xf32>
      %cst_93 = arith.constant 1.000000e+00 : f32
      %377 = vector.broadcast %cst_93 : f32 to vector<4x128xf32>
      %378 = arith.addf %377, %376 : vector<4x128xf32>
      %379 = math.log %378 : vector<4x128xf32>
      %380 = arith.addf %373, %379 : vector<4x128xf32>
      %381 = vector.broadcast %367 : vector<4x1xf32> to vector<4x128xf32>
      %382 = arith.addf %380, %381 : vector<4x128xf32>
      %cst_94 = arith.constant -1.000000e+09 : f32
      %383 = vector.broadcast %cst_94 : f32 to vector<4x128xf32>
      %384 = arith.select %39, %370, %383 : vector<4x128xi1>, vector<4x128xf32>
      %385 = arith.maximumf %364, %361 : vector<4x128xf32>
      %386 = arith.maximumf %385, %384 : vector<4x128xf32>
      %387 = arith.subf %364, %386 : vector<4x128xf32>
      %388 = math.exp %387 : vector<4x128xf32>
      %389 = arith.subf %361, %386 : vector<4x128xf32>
      %390 = math.exp %389 : vector<4x128xf32>
      %391 = arith.addf %388, %390 : vector<4x128xf32>
      %392 = arith.subf %384, %386 : vector<4x128xf32>
      %393 = math.exp %392 : vector<4x128xf32>
      %394 = arith.addf %391, %393 : vector<4x128xf32>
      %395 = math.log %394 : vector<4x128xf32>
      %396 = arith.addf %386, %395 : vector<4x128xf32>
      %397 = arith.addf %396, %366 : vector<4x128xf32>
      %c8_i32_95 = arith.constant 8 : i32
      %398 = arith.muli %arg14, %c8_i32_95 : i32
      %399 = arith.addi %44, %398 : i32
      %c7_i32 = arith.constant 7 : i32
      %400 = arith.addi %399, %c7_i32 : i32
      %401 = vector.broadcast %400 : i32 to vector<4x1xi32>
      %402 = arith.cmpi slt, %401, %40 : vector<4x1xi32>
      %403 = vector.shape_cast %402 : vector<4x1xi1> to vector<4x1xi1>
      %404 = vector.broadcast %403 : vector<4x1xi1> to vector<4x128xi1>
      %405 = arith.select %404, %382, %361 : vector<4x128xi1>, vector<4x128xf32>
      %406 = vector.shape_cast %402 : vector<4x1xi1> to vector<4x1xi1>
      %407 = vector.broadcast %406 : vector<4x1xi1> to vector<4x128xi1>
      %408 = arith.select %407, %397, %364 : vector<4x128xi1>, vector<4x128xf32>
      scf.yield %405, %408 : vector<4x128xf32>, vector<4x128xf32>
    }
    %c2_i32_35 = arith.constant 2 : i32
    %c0_36 = arith.constant 0 : index
    %c0_37 = arith.constant 0 : index
    %49 = vector.load %arg11[%c0_36, %c0_37] : memref<4x128xf32, #tpu.memory_space<vmem>>, vector<4x128xf32>
    tpu.vector_store %arg11[%c0_36, %c0_37], %48#0 {strides = array<i32>} : memref<4x128xf32, #tpu.memory_space<vmem>>, vector<4x128xf32>,
    %c0_38 = arith.constant 0 : index
    %c0_39 = arith.constant 0 : index
    %50 = vector.load %arg12[%c0_38, %c0_39] : memref<4x128xf32, #tpu.memory_space<vmem>>, vector<4x128xf32>
    tpu.vector_store %arg12[%c0_38, %c0_39], %48#1 {strides = array<i32>} : memref<4x128xf32, #tpu.memory_space<vmem>>, vector<4x128xf32>,
    %c0_i32_40 = arith.constant 0 : i32
    %51 = arith.cmpi eq, %arg1, %c0_i32_40 : i32
    %52 = arith.extui %51 : i1 to i32
    %c0_i32_41 = arith.constant 0 : i32
    %53 = arith.cmpi ne, %52, %c0_i32_41 : i32
    scf.if %53 {
      %c0_42 = arith.constant 0 : index
      %c0_43 = arith.constant 0 : index
      %54 = vector.load %arg9[%c0_42, %c0_43] : memref<4x32xf32, #tpu.memory_space<vmem>>, vector<4x32xf32>
      %cst_44 = arith.constant 1.250000e-01 : f32
      %55 = vector.broadcast %cst_44 : f32 to vector<4x32xf32>
      %56 = arith.mulf %54, %55 : vector<4x32xf32>
      %c0_45 = arith.constant 0 : index
      %c0_46 = arith.constant 0 : index
      %57 = vector.load %arg9[%c0_45, %c0_46] : memref<4x32xf32, #tpu.memory_space<vmem>>, vector<4x32xf32>
      tpu.vector_store %arg9[%c0_45, %c0_46], %56 {strides = array<i32>} : memref<4x32xf32, #tpu.memory_space<vmem>>, vector<4x32xf32>,
      %c0_47 = arith.constant 0 : index
      %c0_48 = arith.constant 0 : index
      %58 = vector.load %arg6[%c0_47, %c0_48] : memref<4x1xi32, #tpu.memory_space<vmem>>, vector<4x1xi32>
      %59 = vector.broadcast %58 : vector<4x1xi32> to vector<4x128xi32>
      %60 = arith.cmpi eq, %41, %59 : vector<4x128xi32>
      %cst_49 = arith.constant -1.000000e+09 : f32
      %61 = vector.broadcast %cst_49 : f32 to vector<4x128xf32>
      %62 = arith.select %60, %48#0, %61 : vector<4x128xi1>, vector<4x128xf32>
      %c1_i32_50 = arith.constant 1 : i32
      %63 = vector.broadcast %c1_i32_50 : i32 to vector<4x1xi32>
      %64 = arith.subi %58, %63 : vector<4x1xi32>
      %65 = vector.broadcast %64 : vector<4x1xi32> to vector<4x128xi32>
      %66 = arith.cmpi eq, %41, %65 : vector<4x128xi32>
      %cst_51 = arith.constant -1.000000e+09 : f32
      %67 = vector.broadcast %cst_51 : f32 to vector<4x128xf32>
      %68 = arith.select %66, %48#1, %67 : vector<4x128xi1>, vector<4x128xf32>
      %cst_52 = arith.constant dense<0xFF800000> : vector<4xf32>
      %69 = vector.multi_reduction <maximumf>, %62, %cst_52 [1] : vector<4x128xf32> to vector<4xf32>
      %70 = vector.shape_cast %69 : vector<4xf32> to vector<4x1xf32>
      %cst_53 = arith.constant dense<0xFF800000> : vector<4xf32>
      %71 = vector.multi_reduction <maximumf>, %68, %cst_53 [1] : vector<4x128xf32> to vector<4xf32>
      %72 = vector.shape_cast %71 : vector<4xf32> to vector<4x1xf32>
      %73 = arith.maximumf %70, %72 : vector<4x1xf32>
      %74 = vector.broadcast %73 : vector<4x1xf32> to vector<4x128xf32>
      %75 = arith.subf %62, %74 : vector<4x128xf32>
      %76 = math.exp %75 : vector<4x128xf32>
      %cst_54 = arith.constant dense<0.000000e+00> : vector<4xf32>
      %77 = vector.multi_reduction <add>, %76, %cst_54 [1] : vector<4x128xf32> to vector<4xf32>
      %78 = vector.shape_cast %77 : vector<4xf32> to vector<4x1xf32>
      %79 = vector.broadcast %73 : vector<4x1xf32> to vector<4x128xf32>
      %80 = arith.subf %68, %79 : vector<4x128xf32>
      %81 = math.exp %80 : vector<4x128xf32>
      %cst_55 = arith.constant dense<0.000000e+00> : vector<4xf32>
      %82 = vector.multi_reduction <add>, %81, %cst_55 [1] : vector<4x128xf32> to vector<4xf32>
      %83 = vector.shape_cast %82 : vector<4xf32> to vector<4x1xf32>
      %84 = arith.addf %78, %83 : vector<4x1xf32>
      %85 = math.log %84 : vector<4x1xf32>
      %86 = arith.addf %73, %85 : vector<4x1xf32>
      %cst_56 = arith.constant 0.000000e+00 : f32
      %87 = vector.broadcast %cst_56 : f32 to vector<4x1xf32>
      %88 = arith.subf %87, %86 : vector<4x1xf32>
      %cst_57 = arith.constant 1.000000e+08 : f32
      %89 = vector.broadcast %cst_57 : f32 to vector<4x1xf32>
      %90 = arith.cmpf ogt, %88, %89 : vector<4x1xf32>
      %cst_58 = arith.constant 0.000000e+00 : f32
      %91 = vector.broadcast %cst_58 : f32 to vector<4x1xf32>
      %92 = arith.select %90, %91, %88 : vector<4x1xi1>, vector<4x1xf32>
      %c1_i32_59 = arith.constant 1 : i32
      %93 = vector.broadcast %c1_i32_59 : i32 to vector<4x1xi32>
      %94 = arith.maxsi %58, %93 : vector<4x1xi32>
      %95 = arith.sitofp %94 : vector<4x1xi32> to vector<4x1xf32>
      %96 = arith.divf %92, %95 : vector<4x1xf32>
      %c0_60 = arith.constant 0 : index
      %c0_61 = arith.constant 0 : index
      %97 = vector.load %arg8[%c0_60, %c0_61] : memref<4x1xf32, #tpu.memory_space<vmem>>, vector<4x1xf32>
      tpu.vector_store %arg8[%c0_60, %c0_61], %96 {strides = array<i32>} : memref<4x1xf32, #tpu.memory_space<vmem>>, vector<4x1xf32>,
    } else {
    }
    return
  }
  func.func @transform_0(%arg0: i32, %arg1: i32) -> (i32, i32, i32) {
    %c0_i32 = arith.constant 0 : i32
    %c0_i32_0 = arith.constant 0 : i32
    return %arg0, %arg1, %c0_i32 : i32, i32, i32
  }
  func.func @transform_1(%arg0: i32, %arg1: i32) -> (i32, i32) {
    %c0_i32 = arith.constant 0 : i32
    %c0_i32_0 = arith.constant 0 : i32
    return %arg0, %c0_i32 : i32, i32
  }
  func.func @transform_2(%arg0: i32, %arg1: i32) -> (i32, i32) {
    %c0_i32 = arith.constant 0 : i32
    %c0_i32_0 = arith.constant 0 : i32
    return %arg0, %c0_i32 : i32, i32
  }
  func.func @transform_3(%arg0: i32, %arg1: i32) -> (i32, i32) {
    %c0_i32 = arith.constant 0 : i32
    %c0_i32_0 = arith.constant 0 : i32
    return %arg0, %c0_i32 : i32, i32
  }
  func.func @transform_4(%arg0: i32, %arg1: i32) -> (i32, i32) {
    %c0_i32 = arith.constant 0 : i32
    %c0_i32_0 = arith.constant 0 : i32
    return %arg0, %c0_i32 : i32, i32
  }
  func.func @transform_5(%arg0: i32, %arg1: i32) -> (i32, i32, i32) {
    %c0_i32 = arith.constant 0 : i32
    %c0_i32_0 = arith.constant 0 : i32
    return %arg0, %arg1, %c0_i32 : i32, i32, i32
  }
  func.func @transform_6(%arg0: i32, %arg1: i32) -> (i32, i32) {
    %c0_i32 = arith.constant 0 : i32
    %c0_i32_0 = arith.constant 0 : i32
    return %arg0, %c0_i32 : i32, i32
  }
  func.func @transform_7(%arg0: i32, %arg1: i32) -> (i32, i32) {
    %c0_i32 = arith.constant 0 : i32
    %c0_i32_0 = arith.constant 0 : i32
    return %arg0, %c0_i32 : i32, i32
  }
}

</mosaic_0001>

<bundles_post_ra>
// kernel: tpu_custom_call.1
= control target key start
LH: loop header
LB: loop body
LE: loop exit
PB: predicated region body
PF: predicated region fallthrough
CT: control target
= control target key end

     0   :  { %13 = vsyncpa [#allocation7], 0  ;;  %s2051_s0 = inlined_call_operand.hbm [shape: bf16[4,16,16], index: 0, kind: input, shape index: {}]   ;;  %s2052_s1 = inlined_call_operand.vmem [shape: s32[4,128], index: 1, kind: input, shape index: {}]   ;;  %s2053_s2 = inlined_call_operand.vmem [shape: s32[4,128], index: 2, kind: input, shape index: {}]   ;;  %s2054_s3 = inlined_call_operand.vmem [shape: s32[4,1], index: 3, kind: input, shape index: {}]   ;;  %s2055_s4 = inlined_call_operand.vmem [shape: s32[4,1], index: 4, kind: input, shape index: {}]   ;;  %s2056_s5 = inlined_call_operand.hbm [shape: bf16[4,16,32], index: 5, kind: input, shape index: {}]   ;;  %s2057_s6 = inlined_call_operand.vmem [shape: f32[4,1], index: 6, kind: output, shape index: {0}]   ;;  %s2058_s7 = inlined_call_operand.hbm [shape: f32[4,32], index: 7, kind: output, shape index: {1}]  }
   0x1   :  { %14 = vsyncpa [#allocation10], 0 }
   0x2   :  { %15 = vsyncpa [#allocation8], 0  ;;  %s1496_s24 = smov [#allocation6]   ;;  %s1400_s28 = scalar_lea.hbm %s2051_s0, 512 }
   0x3   :  { %s21_s25 = sshll.u32 %s1496_s24, 4  ;;  %p1401_p0 = scmp.ne.s32.totalorder %s2051_s0, %s1400_s28  ;;  %s22_s25 = int_to_ptr.vmem [resolvable:$true] %s21_s25 }
   0x4   :  { %p1404_p1 = scmp.lt.u32.totalorder %s1400_s28, %s2051_s0 }
   0x6   :  { %p1406_p2 = pnand %p1404_p1, %p1401_p0 }
   0x8   :  { %1409 = shalt.err (!%p1406_p2)
}
   0x9   :  { %s1410_s10 = scalar_lea.vmem %s22_s25, 512  ;;  %p1415_p4 = scmp.lt.s32.totalorder %s22_s25, %s22_s25 }
   0xa   :  { %p1411_p3 = scmp.ne.s32.totalorder %s22_s25, %s1410_s10  ;;  %p1416_p5 = scmp.lt.s32.totalorder %s1410_s10, %s1410_s10 }
   0xc   :  { %p1417_p6 = por %p1416_p5, %p1415_p4 }
   0xe   :  { %p1418_p7 = pnand %p1417_p6, %p1411_p3 }
  0x10   :  { %1421 = shalt.err (!%p1418_p7)
}
  0x11   :  { %s1497_s11 = smov 64   ;;  %s1498_s12 = smov 4  }
  0x12   :  { %27 = dma.hbm_to_vmem [thread:$0]  %s2051_s0, 512, %s22_s25, [#allocation7], %s1497_s11, %s1497_s11, %s1498_s12  }
  0x13   :  { %s1499_s15 = smov [#allocation9]   ;;  %s1422_s19 = scalar_lea.hbm %s2056_s5, 512 }
  0x14   :  { %s41_s16 = sshll.u32 %s1499_s15, 4  ;;  %p1423_p8 = scmp.ne.s32.totalorder %s2056_s5, %s1422_s19  ;;  %s42_s16 = int_to_ptr.vmem [resolvable:$true] %s41_s16 }
  0x15   :  { %p1426_p9 = scmp.lt.u32.totalorder %s1422_s19, %s2056_s5 }
  0x17   :  { %p1428_p10 = pnand %p1426_p9, %p1423_p8 }
  0x19   :  { %1431 = shalt.err (!%p1428_p10)
}
  0x1a   :  { %s1432_s24 = scalar_lea.vmem %s42_s16, 512  ;;  %p1437_p12 = scmp.lt.s32.totalorder %s42_s16, %s42_s16 }
  0x1b   :  { %p1433_p11 = scmp.ne.s32.totalorder %s42_s16, %s1432_s24  ;;  %p1438_p13 = scmp.lt.s32.totalorder %s1432_s24, %s1432_s24 }
  0x1d   :  { %p1439_p0 = por %p1438_p13, %p1437_p12 }
  0x1f   :  { %p1440_p1 = pnand %p1439_p0, %p1433_p11 }
  0x21   :  { %1443 = shalt.err (!%p1440_p1)
}
  0x22   :  { %47 = dma.hbm_to_vmem [thread:$0]  %s2056_s5, 512, %s42_s16, [#allocation10], %s1497_s11, %s1497_s11, %s1498_s12  }
  0x23   :  { %1478 = dma.done.wait [#allocation7], 512  }
  0x24   :  { %1479 = vsyncadd [#allocation7], 4294966784 }
  0x25   :  { %1480 = dma.done.wait [#allocation10], 512  }
  0x26   :  { %1481 = vsyncadd [#allocation10], 4294966784  ;;  %vm149_vm0 = vcmask 257024   ;;  %v1500_v0 = vmov 0.0   ;;  %v68_v1 = vlaneseq  ;;  %v1501_v2 = vmov 1966171168  }
  0x27   :  { %150 = vst.msk [vmem:[#allocation11] sm:$0xf] %vm149_vm0, %v1500_v0  ;;  %1188 = vmatprep.subr.bf16.mxu0 %v1500_v0  ;;  %1194 = vmatprep.subr.bf16.mxu1 %v1500_v0  ;;  %v80_v3 = vunpack.c.l.s4 %v1501_v2  ;;  %vm1502_vm1 = vmmov 0   ;;  %vm227_vm2 = vcmask 130048   ;;  %v1585_v4 = vld [vmem:[%s2053_s2] sm:$0xf] }
  0x28   :  { %1190 = vmatprep.mubr.msk.bf16.mxu0 %vm1502_vm1, %v1500_v0  ;;  %1196 = vmatprep.mubr.msk.bf16.mxu1 %vm1502_vm1, %v1500_v0  ;;  %v1590_v5 = vld [vmem:[%s2054_s3] sm:$0xf]  ;;  %v1592_v6 = vld [vmem:[#allocation6] sm:$0xff]   ;;  %v1595_v7 = vshrl.u32 %v68_v1, 7  ;;  %vm553_vm3 = vcmp.ne.s32.totalorder %v1585_v4, 0  ;;  %v1599_v10 = vld [vmem:[#allocation6 + $0x8] sm:$0xff]  }
  0x29   :  { %v81_v8 = vunpack.c.0.s8 %v80_v3  ;;  %v219_v9 = vunpack.c.l.bf16 %v1592_v6  ;;  %v220_v11 = vunpack.c.h.bf16 %v1592_v6  ;;  %v1602_v12 = vld [vmem:[#allocation6 + $0x10] sm:$0xff]   ;;  %v221_v13 = vunpack.c.l.bf16 %v1599_v10  ;;  %v1607_v16 = vld [vmem:[#allocation6 + $0x18] sm:$0xff]   ;;  %v1154_v17 = vld [vmem:[#allocation9] sm:$0xff]  }
  0x2a   :  { %v222_v14 = vunpack.c.h.bf16 %v1599_v10  ;;  %v223_v15 = vunpack.c.l.bf16 %v1602_v12  ;;  %vm168_vm4 = vcmask 261120   ;;  %v224_v19 = vunpack.c.h.bf16 %v1602_v12  ;;  %v1169_v20 = vld [vmem:[#allocation9 + $0x8] sm:$0xff]   ;;  %v1170_v24 = vld [vmem:[#allocation9 + $0x10] sm:$0xff]   ;;  %v1171_v25 = vld [vmem:[#allocation9 + $0x18] sm:$0xff]  }
  0x2b   :  { %v228_v18 = vsel %vm227_vm2, %v219_v9, -inf  ;;  %v1614_v21 = vadd.s32 8, %v1595_v7  ;;  %v234_v22 = vsel %vm227_vm2, %v221_v13, -inf  ;;  %v231_v23 = vsel %vm227_vm2, %v220_v11, -inf }
  0x2c   :  { %229 = vmax.xlane.f32.xlu0 %v228_v18  ;;  %v84_v26 = vsub.s32 %v81_v8, %v1595_v7  ;;  %v1624_v27 = vsub.s32 0, %v1595_v7  ;;  %235 = vmax.xlane.f32.xlu1 %v234_v22  ;;  %v237_v28 = vsel %vm227_vm2, %v222_v14, -inf  ;;  %v240_v29 = vsel %vm227_vm2, %v223_v15, -inf }
  0x2d   :  { %v225_v30 = vunpack.c.l.bf16 %v1607_v16  ;;  %v1155_v31 = vunpack.c.l.bf16 %v1154_v17  ;;  %v243_v32 = vsel %vm227_vm2, %v224_v19, -inf  ;;  %v1156_v33 = vunpack.c.h.bf16 %v1154_v17  ;;  %v1133_v40 = vld.sshfl [vmem:[%s2052_s1] sm:$0x33 pattern:$0x75316420]  ;;  %s1781_s1 = smov 0  }
  0x2e   :  { %v1159_v34 = vunpack.c.l.bf16 %v1169_v20  ;;  %v1160_v35 = vunpack.c.h.bf16 %v1169_v20  ;;  %v226_v36 = vunpack.c.h.bf16 %v1607_v16  ;;  %v1163_v37 = vunpack.c.l.bf16 %v1170_v24 }
  0x2f   :  { %v1164_v38 = vunpack.c.h.bf16 %v1170_v24  ;;  %v1167_v39 = vunpack.c.l.bf16 %v1171_v25  ;;  %v1168_v41 = vunpack.c.h.bf16 %v1171_v25  ;;  %v169_v42 = vsel %vm168_vm4, %v1155_v31, 0.0 }
  0x30   :  { %232 = vmax.xlane.f32.xlu0 %v231_v23  ;;  %v170_v43 = vsel %vm168_vm4, %v1156_v33, 0.0  ;;  %v178_v44 = vsel %vm168_vm4, %v1159_v34, 0.0  ;;  %238 = vmax.xlane.f32.xlu1 %v237_v28  ;;  %v179_v46 = vsel %vm168_vm4, %v1160_v35, 0.0  ;;  %v187_v47 = vsel %vm168_vm4, %v1163_v37, 0.0 }
  0x31   :  { %v171_v45 = vadd.f32 %v170_v43, %v169_v42  ;;  %v188_v48 = vsel %vm168_vm4, %v1164_v38, 0.0  ;;  %v180_v49 = vadd.f32 %v179_v46, %v178_v44  ;;  %v196_v51 = vsel %vm168_vm4, %v1167_v39, 0.0 }
  0x32   :  { %v189_v50 = vadd.f32 %v188_v48, %v187_v47  ;;  %v197_v52 = vsel %vm168_vm4, %v1168_v41, 0.0  ;;  %v85_v55 = vrot.slane %v1133_v40, %v84_v26  ;;  %v78_v56 = vcombine.high %v1133_v40, %v1133_v40 }
  0x33   :  { %v172_v53 = vrot.slane %v171_v45, 4  ;;  %v198_v54 = vadd.f32 %v197_v52, %v196_v51  ;;  %v246_v57 = vsel %vm227_vm2, %v225_v30, -inf  ;;  %v181_v58 = vrot.slane %v180_v49, 4 }
  0x34   :  { %241 = vmax.xlane.f32.xlu0 %v240_v29  ;;  %v190_v59 = vrot.slane %v189_v50, 4  ;;  %244 = vmax.xlane.f32.xlu1 %v243_v32  ;;  %v93_v62 = vcombine.high %v85_v55, %v85_v55  ;;  %v98_v63 = vrot.slane %v85_v55, %v1624_v27  ;;  %v249_v2 = vsel %vm227_vm2, %v226_v36, -inf }
  0x35   :  { %v173_v60 = vadd.f32 %v172_v53, %v171_v45  ;;  %v199_v61 = vrot.slane %v198_v54, 4  ;;  %v182_v3 = vadd.f32 %v181_v58, %v180_v49  ;;  %v92_v17 = vrot.slane %v78_v56, %v84_v26 }
  0x36   :  { %v191_v8 = vadd.f32 %v190_v59, %v189_v50  ;;  %vm111_vm5 = vcmp.eq.s32.totalorder %v1595_v7, %v98_v63  ;;  %vm112_vm6 = vcmp.eq.s32.totalorder %v1614_v21, %v98_v63  ;;  %v1503_v31 = vmov 1.0|1.0  }
  0x37   :  { %v174_v18 = vrot.slane %v173_v60, 2  ;;  %v200_v20 = vadd.f32 %v199_v61, %v198_v54  ;;  %v183_v22 = vrot.slane %v182_v3, 2  ;;  %vm1172_vm7 = vmpackc.low %vm112_vm6, %vm111_vm5  ;;  %v94_v24 = vcombine.high %v92_v17, %v92_v17 }
  0x38   :  { %247 = vmax.xlane.f32.xlu0 %v246_v57  ;;  %v192_v23 = vrot.slane %v191_v8, 2  ;;  %v102_v25 = vrot.slane %v92_v17, %v1624_v27  ;;  %250 = vmax.xlane.f32.xlu1 %v249_v2  ;;  %v106_v26 = vrot.slane %v93_v62, %v1624_v27  ;;  %vm209_vm14 = vcmask 1041409  }
  0x39   :  { %v175_v28 = vadd.f32 %v174_v18, %v173_v60  ;;  %v201_v29 = vrot.slane %v200_v20, 2  ;;  %1189 = vmatpush3.bf16.msk.msra.mxu0 %vm1172_vm7, %v1503_v31  ;;  %v184_v32 = vadd.f32 %v183_v22, %v182_v3  ;;  %v110_v39 = vrot.slane %v94_v24, %v1624_v27  ;;  %v151_v27 = vld [vmem:[#allocation11] sm:$0xf] }
  0x3a   :  { %v193_v33 = vadd.f32 %v192_v23, %v191_v8  ;;  %vm113_vm8 = vcmp.eq.s32.totalorder %v1595_v7, %v102_v25  ;;  %vm114_vm9 = vcmp.eq.s32.totalorder %v1614_v21, %v102_v25  ;;  %1200 = vmatprep.subr.bf16.mxu0 %v1500_v0  ;;  %vm115_vm11 = vcmp.eq.s32.totalorder %v1595_v7, %v106_v26 }
  0x3b   :  { %v176_v34 = vrot.slane %v175_v28, 1  ;;  %v202_v35 = vadd.f32 %v201_v29, %v200_v20  ;;  %vm1174_vm10 = vmpackc.low %vm114_vm9, %vm113_vm8  ;;  %vm116_vm12 = vcmp.eq.s32.totalorder %v1614_v21, %v106_v26  ;;  %v185_v37 = vrot.slane %v184_v32, 1 }
  0x3c   :  { %v194_v38 = vrot.slane %v193_v33, 1  ;;  %1191 = vmatmul.mubr.msk.bf16.vlgmr.msra.gmra.mrb[0].mxu0 %vm227_vm2, %v1592_v6  ;;  %1195 = vmatpush3.bf16.msk.msra.mxu1 %vm1174_vm10, %v1503_v31  ;;  %vm1176_vm13 = vmpackc.low %vm116_vm12, %vm115_vm11  ;;  %vm211_vm15 = vcmask 1042434   ;;  %vm117_vm4 = vcmp.eq.s32.totalorder %v1595_v7, %v110_v39  ;;  %vm118_vm5 = vcmp.eq.s32.totalorder %v1614_v21, %v110_v39 }
  0x3d   :  { %v177_v40 = vadd.f32 %v176_v34, %v175_v28  ;;  %v203_v41 = vrot.slane %v202_v35, 1  ;;  %1201 = vmatpush3.bf16.msk.msra.mxu0 %vm1176_vm13, %v1503_v31  ;;  %1206 = vmatprep.subr.bf16.mxu1 %v1500_v0  ;;  %v186_v42 = vadd.f32 %v185_v37, %v184_v32  ;;  %vm213_vm6 = vcmask 1043459   ;;  %vm1178_vm7 = vmpackc.low %vm118_vm5, %vm117_vm4 }
  0x3e   :  { %v195_v43 = vadd.f32 %v194_v38, %v193_v33  ;;  %1202 = vmatprep.mubr.msk.bf16.mxu0 %vm1502_vm1, %v1500_v0  ;;  %v1733_v28 = vand.u32 127, %v68_v1  ;;  %v1504_v29 = vmov -1e+09  }
  0x3f   :  { %v204_v44 = vadd.f32 %v203_v41, %v202_v35  ;;  %1197 = vmatmul.mubr.msk.bf16.vlgmr.msra.gmra.mrb[0].mxu1 %vm227_vm2, %v1599_v10  ;;  %v210_v45 = vsel %vm209_vm14, %v186_v42, %v177_v40  ;;  %148 = vst [vmem:[#allocation4] sm:$0xf] %v1504_v29 }
  0x40   :  { %1207 = vmatpush3.bf16.msk.msra.mxu1 %vm1178_vm7, %v1503_v31  ;;  %1208 = vmatprep.mubr.msk.bf16.mxu1 %vm1502_vm1, %v1500_v0  ;;  %v212_v7 = vsel %vm211_vm15, %v195_v43, %v210_v45  ;;  %vm145_vm1 = vcmp.eq.s32.totalorder %v1733_v28, 0  ;;  %vm555_vm8 = vcmp.ge.s32.totalorder %v1733_v28, 1 }
  0x41   :  { %v214_v21 = vsel %vm213_vm6, %v204_v44, %v212_v7  ;;  %v146_v31 = vsel %vm145_vm1, 0.0, %v1504_v29 }
  0x42   :  { %v216_v46 = vadd.f32 %v214_v21, %v151_v27  ;;  %147 = vst [vmem:[#allocation3] sm:$0xf] %v146_v31 }
  0x44   :  { %1203 = vmatmul.mubr.msk.bf16.vlgmr.msra.gmra.mrb[4].mxu0 %vm227_vm2, %v1602_v12  ;;  %218 = vst.msk [vmem:[#allocation11] sm:$0xf] %vm149_vm0, %v216_v46 }
  0x46   :  { %v1737_v26 = vld [vmem:[#allocation4] sm:$0xf]  }
  0x47   :  { %1209 = vmatmul.mubr.msk.bf16.vlgmr.msra.gmra.mrb[4].mxu1 %vm227_vm2, %v1607_v16 }
  0x49   :  { %v1739_v32 = vld [vmem:[#allocation3] sm:$0xf]  }
  0xb9   :  { %v1684_v47 = vpop.xlane.xlu0 %229  ;;  %v1689_v0 = vpop.xlane.xlu1 %235 }
  0xba   :  { %v252_v48 = vsub.f32 %v219_v9, %v1684_v47  ;;  %v254_v49 = vsub.f32 %v221_v13, %v1689_v0 }
  0xbc   :  { %v260_v50 = vmul.f32 1.442695, %v252_v48  ;;  %v264_v51 = vmul.f32 1.442695, %v254_v49 }
  0xbd   :  { %v1694_v52 = vpop.xlane.xlu0 %232  ;;  %v1699_v54 = vpop.xlane.xlu1 %238 }
  0xbe   :  { %1258 = vpow2.f32 %v260_v50  ;;  %v253_v53 = vsub.f32 %v220_v11, %v1694_v52  ;;  %v255_v9 = vsub.f32 %v222_v14, %v1699_v54 }
  0xbf   :  { %1260 = vpow2.f32 %v264_v51 }
  0xc0   :  { %v262_v55 = vmul.f32 1.442695, %v253_v53  ;;  %v266_v56 = vmul.f32 1.442695, %v255_v9 }
  0xc1   :  { %v1704_v57 = vpop.xlane.xlu0 %241  ;;  %v1709_v58 = vpop.xlane.xlu1 %244 }
  0xc2   :  { %1262 = vpow2.f32 %v262_v55  ;;  %v256_v13 = vsub.f32 %v223_v15, %v1704_v57  ;;  %v257_v6 = vsub.f32 %v224_v19, %v1709_v58 }
  0xc3   :  { %1264 = vpow2.f32 %v266_v56 }
  0xc4   :  { %v268_v11 = vmul.f32 1.442695, %v256_v13  ;;  %v270_v59 = vmul.f32 1.442695, %v257_v6 }
  0xc5   :  { %v1714_v10 = vpop.xlane.xlu0 %247  ;;  %v1719_v60 = vpop.xlane.xlu1 %250 }
  0xc6   :  { %1266 = vpow2.f32 %v268_v11  ;;  %v258_v14 = vsub.f32 %v225_v30, %v1714_v10  ;;  %v259_v15 = vsub.f32 %v226_v36, %v1719_v60 }
  0xc7   :  { %1268 = vpow2.f32 %v270_v59 }
  0xc8   :  { %v1259_v61 = vpop.eup %1258  ;;  %v272_v62 = vmul.f32 1.442695, %v258_v14  ;;  %v274_v19 = vmul.f32 1.442695, %v259_v15 }
  0xc9   :  { %v1261_v12 = vpop.eup %1260  ;;  %v276_v63 = vsel %vm227_vm2, %v1259_v61, 0.0 }
  0xca   :  { %1270 = vpow2.f32 %v272_v62  ;;  %277 = vadd.xlane.f32.xlu0 %v276_v63  ;;  %v282_v2 = vsel %vm227_vm2, %v1261_v12, 0.0 }
  0xcb   :  { %1272 = vpow2.f32 %v274_v19 }
  0xcc   :  { %v1263_v3 = vpop.eup %1262 }
  0xcd   :  { %v1265_v30 = vpop.eup %1264  ;;  %v279_v8 = vsel %vm227_vm2, %v1263_v3, 0.0 }
  0xce   :  { %283 = vadd.xlane.f32.xlu0 %v282_v2  ;;  %280 = vadd.xlane.f32.xlu1 %v279_v8  ;;  %v285_v16 = vsel %vm227_vm2, %v1265_v30, 0.0 }
  0xd0   :  { %v1267_v36 = vpop.eup %1266 }
  0xd1   :  { %v1269_v17 = vpop.eup %1268  ;;  %v288_v18 = vsel %vm227_vm2, %v1267_v36, 0.0 }
  0xd2   :  { %286 = vadd.xlane.f32.xlu1 %v285_v16  ;;  %289 = vadd.xlane.f32.xlu0 %v288_v18  ;;  %v291_v20 = vsel %vm227_vm2, %v1269_v17, 0.0 }
  0xd4   :  { %v1271_v22 = vpop.eup %1270 }
  0xd5   :  { %v1273_v23 = vpop.eup %1272  ;;  %v294_v24 = vsel %vm227_vm2, %v1271_v22, 0.0 }
  0xd6   :  { %292 = vadd.xlane.f32.xlu1 %v291_v20  ;;  %295 = vadd.xlane.f32.xlu0 %v294_v24  ;;  %v297_v25 = vsel %vm227_vm2, %v1273_v23, 0.0  ;;  %vm526_vm2 = vcmp.le.s32.totalorder %v1733_v28, 3 }
  0xda   :  { %298 = vadd.xlane.f32.xlu1 %v297_v25 }
 0x10f   :  { %v370_v33 = vpop.f32.mrb[0].mxu0 }
 0x110   :  { %v1192_v34 = vpop.f32.mrb[1].mxu0 }
 0x111   :  { %v373_v35 = vpop.f32.mrb[2].mxu0 }
 0x112   :  { %v419_v37 = vpop.f32.mrb[0].mxu1  ;;  %v1193_v38 = vpop.f32.mrb[3].mxu0 }
 0x113   :  { %v1198_v39 = vpop.f32.mrb[1].mxu1 }
 0x114   :  { %v422_v1 = vpop.f32.mrb[2].mxu1 }
 0x115   :  { %v1199_v40 = vpop.f32.mrb[3].mxu1 }
 0x117   :  { %v468_v41 = vpop.f32.mrb[4].mxu0 }
 0x118   :  { %v1204_v42 = vpop.f32.mrb[5].mxu0 }
 0x119   :  { %v1741_v43 = vpop.f32.mrb[6].mxu0 }
 0x11a   :  { %v1743_v44 = vpop.f32.mrb[4].mxu1  ;;  %v1205_v27 = vpop.f32.mrb[7].mxu0 }
 0x11b   :  { %v1210_v45 = vpop.f32.mrb[5].mxu1 }
 0x11c   :  { %v1745_v7 = vpop.f32.mrb[6].mxu1 }
 0x11d   :  { %v1211_v21 = vpop.f32.mrb[7].mxu1 }
 0x157   :  { %v278_v46 = vpop.xlane.xlu0 %277 }
 0x158   :  { %1274 = vlog2.f32 %v278_v46 }
 0x15b   :  { %v281_v48 = vpop.xlane.xlu1 %280  ;;  %v284_v49 = vpop.xlane.xlu0 %283 }
 0x15c   :  { %1276 = vlog2.f32 %v281_v48 }
 0x15d   :  { %1278 = vlog2.f32 %v284_v49 }
 0x15f   :  { %v287_v50 = vpop.xlane.xlu1 %286  ;;  %v290_v51 = vpop.xlane.xlu0 %289 }
 0x160   :  { %1280 = vlog2.f32 %v287_v50 }
 0x161   :  { %1282 = vlog2.f32 %v290_v51 }
 0x162   :  { %v1275_v53 = vpop.eup %1274 }
 0x163   :  { %v301_v9 = vmul.f32 0.6931472, %v1275_v53  ;;  %v293_v55 = vpop.xlane.xlu1 %292  ;;  %v296_v56 = vpop.xlane.xlu0 %295 }
 0x164   :  { %1284 = vlog2.f32 %v293_v55 }
 0x165   :  { %1286 = vlog2.f32 %v296_v56  ;;  %v316_v13 = vadd.f32 %v301_v9, %v1684_v47 }
 0x166   :  { %v1277_v6 = vpop.eup %1276 }
 0x167   :  { %v1279_v11 = vpop.eup %1278  ;;  %v303_v59 = vmul.f32 0.6931472, %v1277_v6  ;;  %v527_v14 = vsub.f32 %v370_v33, %v316_v13  ;;  %v299_v15 = vpop.xlane.xlu1 %298 }
 0x168   :  { %v305_v61 = vmul.f32 0.6931472, %v1279_v11  ;;  %1288 = vlog2.f32 %v299_v15 }
 0x169   :  { %v535_v62 = vsel %vm526_vm2, %v527_v14, -1e+09  ;;  %v317_v12 = vadd.f32 %v303_v59, %v1694_v52 }
 0x16a   :  { %v1281_v19 = vpop.eup %1280  ;;  %543 = vst [vmem:[#allocation5] sm:$0xff] %v535_v62  ;;  %v318_v63 = vadd.f32 %v305_v61, %v1689_v0 }
 0x16b   :  { %v1283_v2 = vpop.eup %1282  ;;  %v307_v47 = vmul.f32 0.6931472, %v1281_v19  ;;  %v528_v3 = vsub.f32 %v373_v35, %v317_v12 }
 0x16c   :  { %v309_v30 = vmul.f32 0.6931472, %v1283_v2  ;;  %v529_v8 = vsub.f32 %v419_v37, %v318_v63 }
 0x16d   :  { %v536_v16 = vsel %vm526_vm2, %v528_v3, -1e+09  ;;  %v319_v36 = vadd.f32 %v307_v47, %v1699_v54 }
 0x16e   :  { %v1285_v17 = vpop.eup %1284  ;;  %v537_v18 = vsel %vm526_vm2, %v529_v8, -1e+09  ;;  %548 = vst [vmem:[#allocation5 + $0x20] sm:$0xff] %v536_v16  ;;  %v320_v52 = vadd.f32 %v309_v30, %v1704_v57 }
 0x16f   :  { %v1287_v20 = vpop.eup %1286  ;;  %v311_v22 = vmul.f32 0.6931472, %v1285_v17  ;;  %544 = vst [vmem:[#allocation5 + $0x8] sm:$0xff] %v537_v18  ;;  %v530_v0 = vsub.f32 %v422_v1, %v319_v36 }
 0x170   :  { %v313_v23 = vmul.f32 0.6931472, %v1287_v20  ;;  %v531_v24 = vsub.f32 %v468_v41, %v320_v52 }
 0x171   :  { %v538_v25 = vsel %vm526_vm2, %v530_v0, -1e+09  ;;  %v321_v29 = vadd.f32 %v311_v22, %v1709_v58 }
 0x172   :  { %v1289_v31 = vpop.eup %1288  ;;  %549 = vst [vmem:[#allocation5 + $0x28] sm:$0xff] %v538_v25  ;;  %v539_v54 = vsel %vm526_vm2, %v531_v24, -1e+09  ;;  %v322_v33 = vadd.f32 %v313_v23, %v1714_v10 }
 0x173   :  { %v315_v34 = vmul.f32 0.6931472, %v1289_v31  ;;  %545 = vst [vmem:[#allocation5 + $0x10] sm:$0xff] %v539_v54  ;;  %v532_v57 = vsub.f32 %v1741_v43, %v321_v29 }
 0x174   :  { %v533_v35 = vsub.f32 %v1743_v44, %v322_v33 }
 0x175   :  { %v540_v37 = vsel %vm526_vm2, %v532_v57, -1e+09  ;;  %v323_v38 = vadd.f32 %v315_v34, %v1719_v60 }
 0x176   :  { %v541_v58 = vsel %vm526_vm2, %v533_v35, -1e+09  ;;  %550 = vst [vmem:[#allocation5 + $0x30] sm:$0xff] %v540_v37 }
 0x177   :  { %546 = vst [vmem:[#allocation5 + $0x18] sm:$0xff] %v541_v58  ;;  %v534_v39 = vsub.f32 %v1745_v7, %v323_v38 }
 0x179   :  { %v542_v10 = vsel %vm526_vm2, %v534_v39, -1e+09 }
 0x17a   :  { %551 = vst [vmem:[#allocation5 + $0x38] sm:$0xff] %v542_v10 }
 0x17b LB: > { %v1505_v60 = vmov 3   ;;  %v1506_v1 = vmov 0   ;;  %s1507_s29 = smov 1   ;;  %s1150_s30 = sshll.u32 %s1494_s1, 5  ;;  %v611_v11 = vmax.f32 %v1486_v26, %v1490_v32  ;;  %s1494_s1 = sphi %s1781_s1, %s564_s1   ;;  %v1490_v32 = vphi %v1739_v32, %v2060_v32   ;;  %v1486_v26 = vphi %v1737_v26, %v2059_v26  }
 0x17c   : > { %1291 = vset.pattern.permute.xlu1 %v1505_v60  ;;  %1290 = vset.pattern.permute.xlu0 %v1506_v1  ;;  %s1796_s8 = sshll.u32 %s1494_s1, 3  ;;  %s568_s9 = scalar_lea.vmem [#allocation5], %s1150_s30 }
 0x17d   : > { %573 = vrot.lane.b32.xlu0 %v1486_v26, %s1507_s29  ;;  %v637_v40 = vstv %s1796_s8  ;;  %s692_s10 = sadd.s32 1, %s1796_s8  ;;  %s748_s11 = sadd.s32 2, %s1796_s8 }
 0x17e   : > { %vm638_vm9 = vcmp.lt.s32.totalorder %v637_v40, %v1590_v5  ;;  %v693_v45 = vstv %s692_s10  ;;  %v749_v21 = vstv %s748_s11  ;;  %s804_s12 = sadd.s32 3, %s1796_s8  ;;  %s862_s13 = sadd.s32 4, %s1796_s8 }
 0x17f   : > { %v639_v42 = vsel %vm638_vm9, 1, %v1506_v1  ;;  %vm694_vm10 = vcmp.lt.s32.totalorder %v693_v45, %v1590_v5  ;;  %vm750_vm11 = vcmp.lt.s32.totalorder %v749_v21, %v1590_v5  ;;  %v805_v48 = vstv %s804_s12  ;;  %s920_s14 = sadd.s32 5, %s1796_s8  ;;  %s978_s15 = sadd.s32 6, %s1796_s8 }
 0x180   : > { %v1814_v7 = vsel %vm694_vm10, 1, %v1506_v1  ;;  %v1818_v46 = vsel %vm750_vm11, 1, %v1506_v1  ;;  %vm806_vm12 = vcmp.lt.s32.totalorder %v805_v48, %v1590_v5  ;;  %v863_v50 = vstv %s862_s13  ;;  %s1036_s16 = sadd.s32 7, %s1796_s8  ;;  %s564_s1 = sadd.s32 1, %s1494_s1  }
 0x181   : > { %v1799_v41 = vld [vmem:[%s568_s9 + $0x8] sm:$0xff]  ;;  %641 = vperm.xlu0 %1290, %v639_v42   ;;  %v1803_v43 = vld [vmem:[%s568_s9 + $0x10] sm:$0xff]  ;;  %v1805_v44 = vld [vmem:[%s568_s9 + $0x18] sm:$0xff]  ;;  %v1822_v49 = vsel %vm806_vm12, 1, %v1506_v1  ;;  %vm864_vm13 = vcmp.lt.s32.totalorder %v863_v50, %v1590_v5  ;;  %v921_v53 = vstv %s920_s14  ;;  %p561_p2 = scmp.ge.s32.totalorder %s564_s1, 2  }
 0x182   : > { %592 = vperm.xlu1 %1291, %v1799_v41   ;;  %v1808_v27 = vld [vmem:[%s568_s9] sm:$0xff]  ;;  %v1826_v51 = vsel %vm864_vm13, 1, %v1506_v1  ;;  %vm922_vm4 = vcmp.lt.s32.totalorder %v921_v53, %v1590_v5  ;;  %v979_v55 = vstv %s978_s15  ;;  %v1037_v13 = vstv %s1036_s16 }
 0x183   : > { %v1830_v9 = vsel %vm922_vm4, 1, %v1506_v1  ;;  %vm980_vm5 = vcmp.lt.s32.totalorder %v979_v55, %v1590_v5  ;;  %vm1038_vm7 = vcmp.lt.s32.totalorder %v1037_v13, %v1590_v5  ;;  %v627_v10 = vrot.slane %v1799_v41, 7 }
 0x184   : > { %v1834_v56 = vsel %vm980_vm5, 1, %v1506_v1  ;;  %v1838_v6 = vsel %vm1038_vm7, 1, %v1506_v1  ;;  %v629_v13 = vrot.slane %v1803_v43, 6  ;;  %vm1066_vm5 = vcmask (%p561_p2), 1043456  }
 0x185   : > { %1292 = vset.pattern.permute.xlu0 %v1505_v60 }
 0x186   : > { %596 = vperm.xlu1 %1291, %v1803_v43   ;;  %600 = vperm.xlu0 %1292, %v1805_v44  }
 0x18a   : > { %588 = vperm.xlu1 %1291, %v1808_v27   ;;  %1294 = vset.pattern.permute.xlu0 %v1506_v1 }
 0x18e   : > { %1293 = vset.pattern.permute.xlu1 %v1506_v1 }
 0x1ef   : > { %v574_v59 = vpop.permute.xlu0 %573 }
 0x1f0   : > { %v1844_v14 = vsel %vm555_vm8, %v574_v59, -1e+09 }
 0x1f1   : > { %v576_v15 = vsub.f32 %v1490_v32, %v1844_v14  ;;  %v610_v61 = vsel %vm553_vm3, %v1844_v14, -1e+09 }
 0x1f2   : > { %v1851_v62 = vmax.f32 %v611_v11, %v610_v61 }
 0x1f3   : > { %v577_v12 = vand.u32 2147483647, %v576_v15  ;;  %v628_v15 = vsel %vm209_vm14, %v627_v10, %v1808_v27 }
 0x1f4   : > { %v613_v19 = vsub.f32 %v1486_v26, %v1851_v62  ;;  %v616_v63 = vsub.f32 %v1490_v32, %v1851_v62  ;;  %v620_v2 = vsub.f32 %v610_v61, %v1851_v62 }
 0x1f5   : > { %v579_v47 = vsub.f32 0.0, %v577_v12 }
 0x1f6   : > { %v614_v3 = vmul.f32 1.442695, %v613_v19  ;;  %v617_v30 = vmul.f32 1.442695, %v616_v63  ;;  %v621_v16 = vmul.f32 1.442695, %v620_v2 }
 0x1f7   : > { %v580_v8 = vmul.f32 1.442695, %v579_v47 }
 0x1f8   : > { %1295 = vpow2.f32 %v614_v3 }
 0x1f9   : > { %1297 = vpow2.f32 %v580_v8 }
 0x1fa   : > { %1299 = vpow2.f32 %v617_v30 }
 0x1fb   : > { %1301 = vpow2.f32 %v621_v16 }
 0x200   : > { %v1858_v0 = vpop.permute.xlu0 %641 }
 0x201   : > { %v593_v36 = vpop.permute.xlu1 %592  ;;  %vm643_vm1 = vcmp.eq.s32.totalorder %v1858_v0, 1 }
 0x202   : > { %v1296_v17 = vpop.eup %1295  ;;  %v602_v25 = vrot.slane %v593_v36, 7  ;;  %v716_v29 = vrot.slane %v593_v36, 1  ;;  %v772_v31 = vrot.slane %v593_v36, 2  ;;  %v828_v35 = vrot.slane %v593_v36, 3 }
 0x203   : > { %v1298_v18 = vpop.eup %1297  ;;  %v886_v12 = vrot.slane %v593_v36, 4  ;;  %v944_v47 = vrot.slane %v593_v36, 5 }
 0x204   : > { %v1300_v20 = vpop.eup %1299  ;;  %v582_v22 = vadd.f32 1.0, %v1298_v18 }
 0x205   : > { %v597_v52 = vpop.permute.xlu1 %596  ;;  %v619_v23 = vadd.f32 %v1300_v20, %v1296_v17  ;;  %v1302_v24 = vpop.eup %1301  ;;  %v1002_v17 = vrot.slane %v593_v36, 6  ;;  %v631_v20 = vrot.slane %v1805_v44, 5 }
 0x206   : > { %1303 = vlog2.f32 %v582_v22  ;;  %v661_v34 = vrot.slane %v597_v52, 7  ;;  %v774_v57 = vrot.slane %v597_v52, 1  ;;  %v830_v39 = vrot.slane %v597_v52, 2  ;;  %v1864_v21 = vpop.permute.xlu0 %600 }
 0x207   : > { %v623_v54 = vadd.f32 %v1302_v24, %v619_v23  ;;  %v604_v1 = vrot.slane %v597_v52, 6  ;;  %v888_v19 = vrot.slane %v597_v52, 3  ;;  %v606_v63 = vrot.slane %v1864_v21, 5 }
 0x208   : > { %v946_v3 = vrot.slane %v597_v52, 4  ;;  %v1004_v24 = vrot.slane %v597_v52, 5 }
 0x209   : > { %v589_v33 = vpop.permute.xlu1 %588  ;;  %1305 = vlog2.f32 %v623_v54 }
 0x20a   : > { %v659_v37 = vrot.slane %v589_v33, 1  ;;  %v715_v38 = vrot.slane %v589_v33, 2  ;;  %v771_v58 = vrot.slane %v589_v33, 3  ;;  %v827_v60 = vrot.slane %v589_v33, 4 }
 0x20b   : > { %v603_v11 = vsel %vm209_vm14, %v602_v25, %v589_v33  ;;  %v885_v61 = vrot.slane %v589_v33, 5  ;;  %v943_v2 = vrot.slane %v589_v33, 6  ;;  %v1001_v16 = vrot.slane %v589_v33, 7 }
 0x20c   : > { %v660_v40 = vsel %vm209_vm14, %v593_v36, %v659_v37  ;;  %v717_v42 = vsel %vm209_vm14, %v716_v29, %v715_v38  ;;  %v773_v45 = vsel %vm209_vm14, %v772_v31, %v771_v58  ;;  %v829_v55 = vsel %vm209_vm14, %v828_v35, %v827_v60 }
 0x20d   : > { %v1867_v48 = vsel %vm211_vm15, %v661_v34, %v660_v40  ;;  %v1870_v50 = vsel %vm211_vm15, %v597_v52, %v717_v42  ;;  %v1873_v53 = vsel %vm211_vm15, %v774_v57, %v773_v45  ;;  %v1879_v59 = vsel %vm211_vm15, %v830_v39, %v829_v55 }
 0x20e   : > { %v605_v30 = vsel %vm211_vm15, %v604_v1, %v603_v11  ;;  %v887_v8 = vsel %vm209_vm14, %v886_v12, %v885_v61  ;;  %v945_v23 = vsel %vm209_vm14, %v944_v47, %v943_v2  ;;  %v578_v25 = vmax.f32 %v1490_v32, %v1844_v14 }
 0x20f   : > { %v1888_v22 = vsel %vm211_vm15, %v888_v19, %v887_v8  ;;  %v1894_v31 = vsel %vm211_vm15, %v946_v3, %v945_v23  ;;  %v1003_v54 = vsel %vm209_vm14, %v1002_v17, %v1001_v16  ;;  %v630_v36 = vsel %vm211_vm15, %v629_v13, %v628_v15 }
 0x210   : > { %v1304_v18 = vpop.eup %1303  ;;  %v607_v33 = vsel %vm213_vm6, %v606_v63, %v605_v30  ;;  %v1900_v34 = vsel %vm211_vm15, %v1004_v24, %v1003_v54  ;;  %v632_v14 = vsel %vm213_vm6, %v631_v20, %v630_v36  ;;  %v684_v19 = vrot.slane %v1808_v27, 1 }
 0x211   : > { %v584_v29 = vmul.f32 0.6931472, %v1304_v18  ;;  %v686_v63 = vrot.slane %v1803_v43, 7  ;;  %v663_v3 = vrot.slane %v1864_v21, 6  ;;  %v688_v16 = vrot.slane %v1805_v44, 6 }
 0x212   : > { %v685_v2 = vsel %vm209_vm14, %v1799_v41, %v684_v19 }
 0x213   : > { %v1306_v57 = vpop.eup %1305  ;;  %v585_v35 = vadd.f32 %v584_v29, %v578_v25  ;;  %v687_v17 = vsel %vm211_vm15, %v686_v63, %v685_v2  ;;  %v664_v24 = vsel %vm213_vm6, %v663_v3, %v1867_v48 }
 0x214   : > { %v625_v37 = vmul.f32 0.6931472, %v1306_v57  ;;  %v689_v54 = vsel %vm213_vm6, %v688_v16, %v687_v17 }
 0x215   : > { %v609_v52 = vadd.f32 %v607_v33, %v585_v35 }
 0x216   : > { %v626_v38 = vadd.f32 %v625_v37, %v1851_v62 }
 0x217   : > { %v644_v58 = vsel %vm643_vm1, %v609_v52, %v1490_v32 }
 0x218   : > { %v634_v39 = vadd.f32 %v632_v14, %v626_v38 }
 0x21a   : > { %v645_v10 = vsel %vm643_vm1, %v634_v39, %v1486_v26 }
 0x21b   : > { %646 = vrot.lane.b32.xlu1 %v645_v10, %s1507_s29  ;;  %v668_v62 = vmax.f32 %v645_v10, %v644_v58 }
 0x21f   : > { %697 = vperm.xlu1 %1293, %v1814_v7  }
 0x223   : > { %753 = vperm.xlu1 %1293, %v1818_v46  }
 0x227   : > { %809 = vperm.xlu1 %1293, %v1822_v49  }
 0x22b   : > { %867 = vperm.xlu1 %1293, %v1826_v51  }
 0x22f   : > { %925 = vperm.xlu1 %1293, %v1830_v9  }
 0x233   : > { %983 = vperm.xlu1 %1293, %v1834_v56  }
 0x237   : > { %1041 = vperm.xlu1 %1293, %v1838_v6  }
 0x28d   : > { %v647_v32 = vpop.permute.xlu1 %646 }
 0x28e   : > { %v648_v26 = vsel %vm555_vm8, %v647_v32, -1e+09 }
 0x28f   : > { %v649_v0 = vsub.f32 %v644_v58, %v648_v26  ;;  %v667_v7 = vsel %vm553_vm3, %v648_v26, -1e+09  ;;  %v651_v30 = vmax.f32 %v644_v58, %v648_v26 }
 0x290   : > { %v669_v46 = vmax.f32 %v668_v62, %v667_v7 }
 0x291   : > { %v650_v60 = vand.u32 2147483647, %v649_v0 }
 0x292   : > { %v670_v49 = vsub.f32 %v645_v10, %v669_v46  ;;  %v673_v1 = vsub.f32 %v644_v58, %v669_v46  ;;  %v677_v51 = vsub.f32 %v667_v7, %v669_v46 }
 0x293   : > { %v652_v40 = vsub.f32 0.0, %v650_v60 }
 0x294   : > { %v671_v9 = vmul.f32 1.442695, %v670_v49  ;;  %v674_v42 = vmul.f32 1.442695, %v673_v1  ;;  %v678_v6 = vmul.f32 1.442695, %v677_v51 }
 0x295   : > { %v653_v56 = vmul.f32 1.442695, %v652_v40 }
 0x296   : > { %1307 = vpow2.f32 %v671_v9 }
 0x297   : > { %1309 = vpow2.f32 %v653_v56 }
 0x298   : > { %1311 = vpow2.f32 %v674_v42 }
 0x299   : > { %1313 = vpow2.f32 %v678_v6  ;;  %v740_v6 = vrot.slane %v1808_v27, 2 }
 0x29e   : > { %v698_v23 = vpop.permute.xlu1 %697 }
 0x29f   : > { %vm699_vm2 = vcmp.eq.s32.totalorder %v698_v23, 1 }
 0x2a0   : > { %v1308_v45 = vpop.eup %1307 }
 0x2a1   : > { %v1310_v55 = vpop.eup %1309 }
 0x2a2   : > { %v1312_v13 = vpop.eup %1311  ;;  %v655_v11 = vadd.f32 1.0, %v1310_v55 }
 0x2a3   : > { %v676_v15 = vadd.f32 %v1312_v13, %v1308_v45  ;;  %v1314_v61 = vpop.eup %1313  ;;  %v741_v45 = vrot.slane %v1799_v41, 1 }
 0x2a4   : > { %1315 = vlog2.f32 %v655_v11  ;;  %v719_v11 = vrot.slane %v1864_v21, 7 }
 0x2a5   : > { %v680_v12 = vadd.f32 %v1314_v61, %v676_v15  ;;  %v742_v55 = vsel %vm209_vm14, %v741_v45, %v740_v6  ;;  %v776_v45 = vsel %vm213_vm6, %v1864_v21, %v1873_v53 }
 0x2a6   : > { %v743_v19 = vsel %vm211_vm15, %v1803_v43, %v742_v55 }
 0x2a7   : > { %1317 = vlog2.f32 %v680_v12  ;;  %v744_v12 = vrot.slane %v1805_v44, 7 }
 0x2a9   : > { %v745_v16 = vsel %vm213_vm6, %v744_v12, %v743_v19 }
 0x2ae   : > { %v1316_v47 = vpop.eup %1315 }
 0x2af   : > { %v657_v8 = vmul.f32 0.6931472, %v1316_v47  ;;  %v720_v47 = vsel %vm213_vm6, %v719_v11, %v1870_v50 }
 0x2b1   : > { %v1318_v18 = vpop.eup %1317  ;;  %v658_v20 = vadd.f32 %v657_v8, %v651_v30  ;;  %v754_v30 = vpop.permute.xlu1 %753 }
 0x2b2   : > { %v682_v25 = vmul.f32 0.6931472, %v1318_v18  ;;  %vm755_vm9 = vcmp.eq.s32.totalorder %v754_v30, 1 }
 0x2b3   : > { %v666_v29 = vadd.f32 %v664_v24, %v658_v20 }
 0x2b4   : > { %v683_v36 = vadd.f32 %v682_v25, %v669_v46 }
 0x2b5   : > { %v700_v33 = vsel %vm699_vm2, %v666_v29, %v644_v58 }
 0x2b6   : > { %v691_v57 = vadd.f32 %v689_v54, %v683_v36 }
 0x2b8   : > { %v701_v35 = vsel %vm699_vm2, %v691_v57, %v645_v10 }
 0x2b9   : > { %702 = vrot.lane.b32.xlu0 %v701_v35, %s1507_s29  ;;  %v724_v52 = vmax.f32 %v701_v35, %v700_v33 }
 0x32b   : > { %v703_v37 = vpop.permute.xlu0 %702 }
 0x32c   : > { %v704_v14 = vsel %vm555_vm8, %v703_v37, -1e+09 }
 0x32d   : > { %v705_v38 = vsub.f32 %v700_v33, %v704_v14  ;;  %v723_v48 = vsel %vm553_vm3, %v704_v14, -1e+09  ;;  %v707_v15 = vmax.f32 %v700_v33, %v704_v14 }
 0x32e   : > { %v725_v39 = vmax.f32 %v724_v52, %v723_v48 }
 0x32f   : > { %v706_v32 = vand.u32 2147483647, %v705_v38 }
 0x330   : > { %v726_v26 = vsub.f32 %v701_v35, %v725_v39  ;;  %v729_v62 = vsub.f32 %v700_v33, %v725_v39  ;;  %v733_v0 = vsub.f32 %v723_v48, %v725_v39 }
 0x331   : > { %v708_v7 = vsub.f32 0.0, %v706_v32 }
 0x332   : > { %v727_v58 = vmul.f32 1.442695, %v726_v26  ;;  %v730_v46 = vmul.f32 1.442695, %v729_v62  ;;  %v734_v60 = vmul.f32 1.442695, %v733_v0 }
 0x333   : > { %v709_v10 = vmul.f32 1.442695, %v708_v7 }
 0x334   : > { %1319 = vpow2.f32 %v727_v58 }
 0x335   : > { %1321 = vpow2.f32 %v709_v10  ;;  %v796_v10 = vrot.slane %v1808_v27, 3 }
 0x336   : > { %1323 = vpow2.f32 %v730_v46 }
 0x337   : > { %1325 = vpow2.f32 %v734_v60  ;;  %v797_v60 = vrot.slane %v1799_v41, 2 }
 0x33e   : > { %v1320_v49 = vpop.eup %1319 }
 0x33f   : > { %v1322_v1 = vpop.eup %1321 }
 0x340   : > { %v1324_v51 = vpop.eup %1323  ;;  %v711_v40 = vadd.f32 1.0, %v1322_v1  ;;  %v798_v1 = vsel %vm209_vm14, %v797_v60, %v796_v10 }
 0x341   : > { %v732_v9 = vadd.f32 %v1324_v51, %v1320_v49  ;;  %v1326_v42 = vpop.eup %1325  ;;  %v799_v49 = vrot.slane %v1803_v43, 1 }
 0x342   : > { %1327 = vlog2.f32 %v711_v40 }
 0x343   : > { %v736_v56 = vadd.f32 %v1326_v42, %v732_v9  ;;  %v800_v42 = vsel %vm211_vm15, %v799_v49, %v798_v1 }
 0x345   : > { %1329 = vlog2.f32 %v736_v56 }
 0x34c   : > { %v1328_v13 = vpop.eup %1327 }
 0x34d   : > { %v713_v61 = vmul.f32 0.6931472, %v1328_v13  ;;  %v810_v13 = vpop.permute.xlu1 %809 }
 0x34e   : > { %vm811_vm10 = vcmp.eq.s32.totalorder %v810_v13, 1 }
 0x34f   : > { %v1330_v63 = vpop.eup %1329  ;;  %v714_v2 = vadd.f32 %v713_v61, %v707_v15  ;;  %v801_v15 = vsel %vm213_vm6, %v1805_v44, %v800_v42 }
 0x350   : > { %v738_v3 = vmul.f32 0.6931472, %v1330_v63 }
 0x351   : > { %v722_v8 = vadd.f32 %v720_v47, %v714_v2  ;;  %v868_v1 = vpop.permute.xlu1 %867 }
 0x352   : > { %v739_v17 = vadd.f32 %v738_v3, %v725_v39  ;;  %vm869_vm11 = vcmp.eq.s32.totalorder %v868_v1, 1 }
 0x353   : > { %v756_v18 = vsel %vm755_vm9, %v722_v8, %v700_v33 }
 0x354   : > { %v747_v20 = vadd.f32 %v745_v16, %v739_v17 }
 0x356   : > { %v757_v23 = vsel %vm755_vm9, %v747_v20, %v701_v35 }
 0x357   : > { %758 = vrot.lane.b32.xlu0 %v757_v23, %s1507_s29  ;;  %v780_v29 = vmax.f32 %v757_v23, %v756_v18 }
 0x3c9   : > { %v759_v24 = vpop.permute.xlu0 %758 }
 0x3ca   : > { %v760_v25 = vsel %vm555_vm8, %v759_v24, -1e+09 }
 0x3cb   : > { %v761_v54 = vsub.f32 %v756_v18, %v760_v25  ;;  %v779_v50 = vsel %vm553_vm3, %v760_v25, -1e+09  ;;  %v763_v40 = vmax.f32 %v756_v18, %v760_v25 }
 0x3cc   : > { %v781_v36 = vmax.f32 %v780_v29, %v779_v50 }
 0x3cd   : > { %v762_v57 = vand.u32 2147483647, %v761_v54 }
 0x3ce   : > { %v782_v37 = vsub.f32 %v757_v23, %v781_v36  ;;  %v785_v14 = vsub.f32 %v756_v18, %v781_v36  ;;  %v789_v52 = vsub.f32 %v779_v50, %v781_v36 }
 0x3cf   : > { %v764_v38 = vsub.f32 0.0, %v762_v57 }
 0x3d0   : > { %v783_v33 = vmul.f32 1.442695, %v782_v37  ;;  %v786_v48 = vmul.f32 1.442695, %v785_v14  ;;  %v790_v39 = vmul.f32 1.442695, %v789_v52 }
 0x3d1   : > { %v765_v35 = vmul.f32 1.442695, %v764_v38 }
 0x3d2   : > { %1331 = vpow2.f32 %v783_v33  ;;  %v853_v33 = vrot.slane %v1808_v27, 4 }
 0x3d3   : > { %1333 = vpow2.f32 %v765_v35  ;;  %v856_v35 = vrot.slane %v1803_v43, 2 }
 0x3d4   : > { %1335 = vpow2.f32 %v786_v48  ;;  %v854_v48 = vrot.slane %v1799_v41, 3 }
 0x3d5   : > { %1337 = vpow2.f32 %v790_v39 }
 0x3d6   : > { %v855_v39 = vsel %vm209_vm14, %v854_v48, %v853_v33 }
 0x3dc   : > { %v1332_v32 = vpop.eup %1331 }
 0x3dd   : > { %v1334_v26 = vpop.eup %1333 }
 0x3de   : > { %v1336_v62 = vpop.eup %1335  ;;  %v767_v0 = vadd.f32 1.0, %v1334_v26  ;;  %v832_v26 = vrot.slane %v1864_v21, 1 }
 0x3df   : > { %v788_v7 = vadd.f32 %v1336_v62, %v1332_v32  ;;  %v1338_v58 = vpop.eup %1337 }
 0x3e0   : > { %1339 = vlog2.f32 %v767_v0  ;;  %v833_v60 = vsel %vm213_vm6, %v832_v26, %v1879_v59 }
 0x3e1   : > { %v792_v46 = vadd.f32 %v1338_v58, %v788_v7  ;;  %v858_v7 = vrot.slane %v1805_v44, 1  ;;  %v857_v58 = vsel %vm211_vm15, %v856_v35, %v855_v39 }
 0x3e3   : > { %1341 = vlog2.f32 %v792_v46 }
 0x3ea   : > { %v1340_v51 = vpop.eup %1339 }
 0x3eb   : > { %v769_v9 = vmul.f32 0.6931472, %v1340_v51 }
 0x3ed   : > { %v1342_v56 = vpop.eup %1341  ;;  %v770_v6 = vadd.f32 %v769_v9, %v763_v40  ;;  %v859_v40 = vsel %vm213_vm6, %v858_v7, %v857_v58 }
 0x3ee   : > { %v794_v55 = vmul.f32 0.6931472, %v1342_v56 }
 0x3ef   : > { %v778_v11 = vadd.f32 %v776_v45, %v770_v6 }
 0x3f0   : > { %v795_v61 = vadd.f32 %v794_v55, %v781_v36 }
 0x3f1   : > { %v812_v12 = vsel %vm811_vm10, %v778_v11, %v756_v18 }
 0x3f2   : > { %v803_v19 = vadd.f32 %v801_v15, %v795_v61 }
 0x3f4   : > { %v813_v63 = vsel %vm811_vm10, %v803_v19, %v757_v23 }
 0x3f5   : > { %814 = vrot.lane.b32.xlu0 %v813_v63, %s1507_s29  ;;  %v837_v3 = vmax.f32 %v813_v63, %v812_v12 }
 0x467   : > { %v815_v2 = vpop.permute.xlu0 %814 }
 0x468   : > { %v816_v47 = vsel %vm555_vm8, %v815_v2, -1e+09 }
 0x469   : > { %v817_v30 = vsub.f32 %v812_v12, %v816_v47  ;;  %v836_v53 = vsel %vm553_vm3, %v816_v47, -1e+09  ;;  %v819_v62 = vmax.f32 %v812_v12, %v816_v47 }
 0x46a   : > { %v838_v8 = vmax.f32 %v837_v3, %v836_v53 }
 0x46b   : > { %v818_v16 = vand.u32 2147483647, %v817_v30 }
 0x46c   : > { %v839_v17 = vsub.f32 %v813_v63, %v838_v8  ;;  %v842_v20 = vsub.f32 %v812_v12, %v838_v8  ;;  %v846_v24 = vsub.f32 %v836_v53, %v838_v8 }
 0x46d   : > { %v820_v25 = vsub.f32 0.0, %v818_v16 }
 0x46e   : > { %v840_v18 = vmul.f32 1.442695, %v839_v17  ;;  %v843_v29 = vmul.f32 1.442695, %v842_v20  ;;  %v847_v54 = vmul.f32 1.442695, %v846_v24 }
 0x46f   : > { %v821_v23 = vmul.f32 1.442695, %v820_v25 }
 0x470   : > { %1343 = vpow2.f32 %v840_v18 }
 0x471   : > { %1345 = vpow2.f32 %v821_v23  ;;  %v912_v23 = vrot.slane %v1799_v41, 4 }
 0x472   : > { %1347 = vpow2.f32 %v843_v29  ;;  %v911_v29 = vrot.slane %v1808_v27, 5 }
 0x473   : > { %1349 = vpow2.f32 %v847_v54  ;;  %v914_v54 = vrot.slane %v1803_v43, 3 }
 0x47a   : > { %v1344_v50 = vpop.eup %1343 }
 0x47b   : > { %v1346_v36 = vpop.eup %1345 }
 0x47c   : > { %v1348_v57 = vpop.eup %1347  ;;  %v823_v37 = vadd.f32 1.0, %v1346_v36 }
 0x47d   : > { %v845_v14 = vadd.f32 %v1348_v57, %v1344_v50  ;;  %v1350_v52 = vpop.eup %1349  ;;  %v913_v50 = vsel %vm209_vm14, %v912_v23, %v911_v29  ;;  %v890_v57 = vrot.slane %v1864_v21, 2 }
 0x47e   : > { %1351 = vlog2.f32 %v823_v37 }
 0x47f   : > { %v849_v38 = vadd.f32 %v1350_v52, %v845_v14  ;;  %v916_v52 = vrot.slane %v1805_v44, 2  ;;  %v891_v35 = vsel %vm213_vm6, %v890_v57, %v1888_v22 }
 0x481   : > { %1353 = vlog2.f32 %v849_v38  ;;  %v915_v38 = vsel %vm211_vm15, %v914_v54, %v913_v50 }
 0x488   : > { %v1352_v32 = vpop.eup %1351 }
 0x489   : > { %v825_v0 = vmul.f32 0.6931472, %v1352_v32  ;;  %v926_v32 = vpop.permute.xlu1 %925 }
 0x48a   : > { %vm927_vm12 = vcmp.eq.s32.totalorder %v926_v32, 1 }
 0x48b   : > { %v1354_v46 = vpop.eup %1353  ;;  %v826_v10 = vadd.f32 %v825_v0, %v819_v62  ;;  %v917_v62 = vsel %vm213_vm6, %v916_v52, %v915_v38 }
 0x48c   : > { %v851_v49 = vmul.f32 0.6931472, %v1354_v46 }
 0x48d   : > { %v835_v51 = vadd.f32 %v833_v60, %v826_v10  ;;  %v984_v50 = vpop.permute.xlu1 %983 }
 0x48e   : > { %v852_v9 = vadd.f32 %v851_v49, %v838_v8  ;;  %vm985_vm13 = vcmp.eq.s32.totalorder %v984_v50, 1 }
 0x48f   : > { %v870_v42 = vsel %vm869_vm11, %v835_v51, %v812_v12 }
 0x490   : > { %v861_v56 = vadd.f32 %v859_v40, %v852_v9 }
 0x492   : > { %v871_v6 = vsel %vm869_vm11, %v861_v56, %v813_v63 }
 0x493   : > { %872 = vrot.lane.b32.xlu0 %v871_v6, %s1507_s29  ;;  %v895_v13 = vmax.f32 %v871_v6, %v870_v42 }
 0x505   : > { %v873_v45 = vpop.permute.xlu0 %872 }
 0x506   : > { %v874_v55 = vsel %vm555_vm8, %v873_v45, -1e+09 }
 0x507   : > { %v875_v11 = vsub.f32 %v870_v42, %v874_v55  ;;  %v894_v59 = vsel %vm553_vm3, %v874_v55, -1e+09  ;;  %v877_v37 = vmax.f32 %v870_v42, %v874_v55 }
 0x508   : > { %v896_v15 = vmax.f32 %v895_v13, %v894_v59 }
 0x509   : > { %v876_v61 = vand.u32 2147483647, %v875_v11 }
 0x50a   : > { %v897_v19 = vsub.f32 %v871_v6, %v896_v15  ;;  %v900_v2 = vsub.f32 %v870_v42, %v896_v15  ;;  %v904_v47 = vsub.f32 %v894_v59, %v896_v15 }
 0x50b   : > { %v878_v3 = vsub.f32 0.0, %v876_v61 }
 0x50c   : > { %v898_v12 = vmul.f32 1.442695, %v897_v19  ;;  %v901_v30 = vmul.f32 1.442695, %v900_v2  ;;  %v905_v53 = vmul.f32 1.442695, %v904_v47 }
 0x50d   : > { %v879_v63 = vmul.f32 1.442695, %v878_v3 }
 0x50e   : > { %1355 = vpow2.f32 %v898_v12  ;;  %v969_v12 = vrot.slane %v1808_v27, 6 }
 0x50f   : > { %1357 = vpow2.f32 %v879_v63  ;;  %v972_v63 = vrot.slane %v1803_v43, 4 }
 0x510   : > { %1359 = vpow2.f32 %v901_v30  ;;  %v970_v30 = vrot.slane %v1799_v41, 5 }
 0x511   : > { %1361 = vpow2.f32 %v905_v53 }
 0x512   : > { %v971_v53 = vsel %vm209_vm14, %v970_v30, %v969_v12 }
 0x518   : > { %v1356_v8 = vpop.eup %1355 }
 0x519   : > { %v1358_v16 = vpop.eup %1357 }
 0x51a   : > { %v1360_v17 = vpop.eup %1359  ;;  %v881_v20 = vadd.f32 1.0, %v1358_v16  ;;  %v948_v16 = vrot.slane %v1864_v21, 3 }
 0x51b   : > { %v903_v24 = vadd.f32 %v1360_v17, %v1356_v8  ;;  %v1362_v25 = vpop.eup %1361 }
 0x51c   : > { %1363 = vlog2.f32 %v881_v20  ;;  %v949_v23 = vsel %vm213_vm6, %v948_v16, %v1894_v31 }
 0x51d   : > { %v907_v18 = vadd.f32 %v1362_v25, %v903_v24  ;;  %v974_v24 = vrot.slane %v1805_v44, 3  ;;  %v973_v25 = vsel %vm211_vm15, %v972_v63, %v971_v53 }
 0x51f   : > { %1365 = vlog2.f32 %v907_v18  ;;  %v975_v57 = vsel %vm213_vm6, %v974_v24, %v973_v25 }
 0x526   : > { %v1364_v36 = vpop.eup %1363 }
 0x527   : > { %v883_v14 = vmul.f32 0.6931472, %v1364_v36 }
 0x529   : > { %v1366_v33 = vpop.eup %1365  ;;  %v884_v48 = vadd.f32 %v883_v14, %v877_v37 }
 0x52a   : > { %v909_v39 = vmul.f32 0.6931472, %v1366_v33 }
 0x52b   : > { %v893_v26 = vadd.f32 %v891_v35, %v884_v48 }
 0x52c   : > { %v910_v0 = vadd.f32 %v909_v39, %v896_v15 }
 0x52d   : > { %v928_v7 = vsel %vm927_vm12, %v893_v26, %v870_v42 }
 0x52e   : > { %v919_v58 = vadd.f32 %v917_v62, %v910_v0 }
 0x530   : > { %v929_v46 = vsel %vm927_vm12, %v919_v58, %v871_v6 }
 0x531   : > { %930 = vrot.lane.b32.xlu0 %v929_v46, %s1507_s29  ;;  %v953_v49 = vmax.f32 %v929_v46, %v928_v7 }
 0x5a3   : > { %v931_v10 = vpop.permute.xlu0 %930 }
 0x5a4   : > { %v932_v60 = vsel %vm555_vm8, %v931_v10, -1e+09 }
 0x5a5   : > { %v933_v1 = vsub.f32 %v928_v7, %v932_v60  ;;  %v952_v22 = vsel %vm553_vm3, %v932_v60, -1e+09  ;;  %v935_v17 = vmax.f32 %v928_v7, %v932_v60 }
 0x5a6   : > { %v954_v51 = vmax.f32 %v953_v49, %v952_v22 }
 0x5a7   : > { %v934_v40 = vand.u32 2147483647, %v933_v1 }
 0x5a8   : > { %v955_v9 = vsub.f32 %v929_v46, %v954_v51  ;;  %v958_v56 = vsub.f32 %v928_v7, %v954_v51  ;;  %v962_v45 = vsub.f32 %v952_v22, %v954_v51 }
 0x5a9   : > { %v936_v55 = vsub.f32 0.0, %v934_v40 }
 0x5aa   : > { %v956_v42 = vmul.f32 1.442695, %v955_v9  ;;  %v959_v13 = vmul.f32 1.442695, %v958_v56  ;;  %v963_v11 = vmul.f32 1.442695, %v962_v45 }
 0x5ab   : > { %v937_v6 = vmul.f32 1.442695, %v936_v55  ;;  %v1027_v55 = vrot.slane %v1808_v27, 7 }
 0x5ac   : > { %1367 = vpow2.f32 %v956_v42  ;;  %v1028_v42 = vrot.slane %v1799_v41, 6 }
 0x5ad   : > { %1369 = vpow2.f32 %v937_v6 }
 0x5ae   : > { %1371 = vpow2.f32 %v959_v13  ;;  %v1030_v13 = vrot.slane %v1803_v43, 5  ;;  %v1029_v6 = vsel %vm209_vm14, %v1028_v42, %v1027_v55 }
 0x5af   : > { %1373 = vpow2.f32 %v963_v11 }
 0x5b6   : > { %v1368_v59 = vpop.eup %1367 }
 0x5b7   : > { %v1370_v15 = vpop.eup %1369 }
 0x5b8   : > { %v1372_v61 = vpop.eup %1371  ;;  %v939_v19 = vadd.f32 1.0, %v1370_v15  ;;  %v1032_v15 = vrot.slane %v1805_v44, 4  ;;  %v1054_v44 = vld [vmem:[%s2055_s4] sm:$0xf] (%p561_p2)  ;;  %s1509_s4 = smov (%p561_p2), [#allocation11]  }
 0x5b9   : > { %v961_v2 = vadd.f32 %v1372_v61, %v1368_v59  ;;  %v1374_v47 = vpop.eup %1373  ;;  %v1006_v59 = vrot.slane %v1864_v21, 4  ;;  %v1152_v16 = vadd.s32 (%p561_p2), 4294967295, %v1054_v44  ;;  %s1108_s19 = sshll.u32 (%p561_p2), %s1509_s4, 4  ;;  %s1109_s19 = int_to_ptr.vmem [resolvable:$true] %s1108_s19 }
 0x5ba   : > { %1375 = vlog2.f32 %v939_v19  ;;  %s1444_s20 = scalar_lea.vmem (%p561_p2), %s1109_s19, 64  ;;  %p1449_p4 = scmp.lt.s32.totalorder (%p561_p2), %s1109_s19, %s1109_s19 }
 0x5bb   : > { %v965_v3 = vadd.f32 %v1374_v47, %v961_v2  ;;  %v1031_v2 = vsel %vm211_vm15, %v1030_v13, %v1029_v6  ;;  %v1007_v27 = vsel %vm213_vm6, %v1006_v59, %v1900_v34  ;;  %v1508_v34 = vmov (%p561_p2), 0   ;;  %p1445_p3 = scmp.ne.s32.totalorder (%p561_p2), %s1109_s19, %s1444_s20  ;;  %p1450_p5 = scmp.lt.s32.totalorder (%p561_p2), %s1444_s20, %s1444_s20 }
 0x5bc   : > { %v1033_v43 = vsel %vm213_vm6, %v1032_v15, %v1031_v2  ;;  %1391 = vset.pattern.permute.xlu0 (%p561_p2), %v1508_v34 }
 0x5bd   : > { %1377 = vlog2.f32 %v965_v3  ;;  %v1042_v3 = vpop.permute.xlu1 %1041  ;;  %p1451_p6 = por (%p561_p2), %p1450_p5, %p1449_p4 }
 0x5be   : > { %vm1043_vm4 = vcmp.eq.s32.totalorder %v1042_v3, 1 }
 0x5bf   :  { %p1452_p7 = pnand (%p561_p2), %p1451_p6, %p1445_p3 }
 0x5c4   : > { %v1376_v8 = vpop.eup %1375 }
 0x5c5   : > { %v941_v20 = vmul.f32 0.6931472, %v1376_v8 }
 0x5c7   : > { %v1378_v18 = vpop.eup %1377  ;;  %v942_v29 = vadd.f32 %v941_v20, %v935_v17 }
 0x5c8   : > { %v967_v54 = vmul.f32 0.6931472, %v1378_v18 }
 0x5c9   : > { %v951_v36 = vadd.f32 %v949_v23, %v942_v29 }
 0x5ca   : > { %v968_v37 = vadd.f32 %v967_v54, %v954_v51 }
 0x5cb   : > { %v986_v14 = vsel %vm985_vm13, %v951_v36, %v928_v7 }
 0x5cc   : > { %v977_v52 = vadd.f32 %v975_v57, %v968_v37 }
 0x5ce   : > { %v987_v38 = vsel %vm985_vm13, %v977_v52, %v929_v46 }
 0x5cf   : > { %988 = vrot.lane.b32.xlu0 %v987_v38, %s1507_s29  ;;  %v1011_v35 = vmax.f32 %v987_v38, %v986_v14 }
 0x5d3   :  { %1056 = vperm.xlu0 (%p561_p2), %1391, %v1054_v44  }
 0x5d7   :  { %1062 = vperm.xlu0 (%p561_p2), %1391, %v1152_v16  }
 0x641   : > { %v989_v33 = vpop.permute.xlu0 %988 }
 0x642   : > { %v990_v48 = vsel %vm555_vm8, %v989_v33, -1e+09 }
 0x643   : > { %v991_v39 = vsub.f32 %v986_v14, %v990_v48  ;;  %v1010_v31 = vsel %vm553_vm3, %v990_v48, -1e+09  ;;  %v993_v61 = vmax.f32 %v986_v14, %v990_v48 }
 0x644   : > { %v1012_v32 = vmax.f32 %v1011_v35, %v1010_v31 }
 0x645   : > { %v992_v26 = vand.u32 2147483647, %v991_v39 }
 0x646   : > { %v1013_v62 = vsub.f32 %v987_v38, %v1012_v32  ;;  %v1016_v0 = vsub.f32 %v986_v14, %v1012_v32  ;;  %v1020_v58 = vsub.f32 %v1010_v31, %v1012_v32 }
 0x647   : > { %v994_v10 = vsub.f32 0.0, %v992_v26 }
 0x648   : > { %v1014_v7 = vmul.f32 1.442695, %v1013_v62  ;;  %v1017_v60 = vmul.f32 1.442695, %v1016_v0  ;;  %v1021_v49 = vmul.f32 1.442695, %v1020_v58 }
 0x649   : > { %v995_v46 = vmul.f32 1.442695, %v994_v10 }
 0x64a   : > { %1379 = vpow2.f32 %v1014_v7 }
 0x64b   : > { %1381 = vpow2.f32 %v995_v46 }
 0x64c   : > { %1383 = vpow2.f32 %v1017_v60 }
 0x64d   : > { %1385 = vpow2.f32 %v1021_v49 }
 0x652   :  { %v1057_v17 = vpop.permute.xlu0 (%p561_p2), %1056 }
 0x653   :  { %vm1058_vm7 = vcmp.eq.s32.totalorder (%p561_p2), %v1733_v28, %v1057_v17 }
 0x654   : > { %v1380_v1 = vpop.eup %1379 }
 0x655   : > { %v1382_v22 = vpop.eup %1381 }
 0x656   : > { %v1384_v51 = vpop.eup %1383  ;;  %v997_v40 = vadd.f32 1.0, %v1382_v22  ;;  %v1063_v25 = vpop.permute.xlu0 (%p561_p2), %1062 }
 0x657   : > { %v1019_v9 = vadd.f32 %v1384_v51, %v1380_v1  ;;  %v1386_v56 = vpop.eup %1385  ;;  %vm1064_vm3 = vcmp.eq.s32.totalorder (%p561_p2), %v1733_v28, %v1063_v25  ;;  %v1051_v28 = vld [vmem:[#allocation11] sm:$0xf] (%p561_p2) }
 0x658   : > { %1387 = vlog2.f32 %v997_v40  ;;  %v1052_v33 = vmul.f32 (%p561_p2), 0.125, %v1051_v28 }
 0x659   : > { %v1023_v45 = vadd.f32 %v1386_v56, %v1019_v9 }
 0x65a   :  { %1053 = vst.msk [vmem:[#allocation11] sm:$0xf] (%p561_p2), %vm149_vm0, %v1052_v33 }
 0x65b   : > { %1389 = vlog2.f32 %v1023_v45 }
 0x662   : > { %v1388_v11 = vpop.eup %1387 }
 0x663   : > { %v999_v19 = vmul.f32 0.6931472, %v1388_v11 }
 0x665   : > { %v1390_v47 = vpop.eup %1389  ;;  %v1000_v12 = vadd.f32 %v999_v19, %v993_v61 }
 0x666   : > { %v1025_v41 = vmul.f32 0.6931472, %v1390_v47 }
 0x667   : > { %v1009_v30 = vadd.f32 %v1007_v27, %v1000_v12  ;;  %563 = sbr.rel (!%p561_p2) target bundleno = 379 (0x17b), region = 77 }
 0x668   : > { %v1026_v63 = vadd.f32 %v1025_v41, %v1012_v32 }
 0x669   : > { %v1044_v53 = vsel %vm1043_vm4, %v1009_v30, %v986_v14  }
 0x66a   : > { %v1035_v21 = vadd.f32 %v1033_v43, %v1026_v63  ;;  %v2060_v32 = vmov %v1044_v53  ;;  %1046 = vst [vmem:[#allocation3] sm:$0xf] (%p561_p2), %v1044_v53  ;;  %v1059_v20 = vsel (%p561_p2), %vm1058_vm7, %v1044_v53, -1e+09 }
 0x66b   :  { %v1067_v24 = vsel (%p561_p2), %vm1066_vm5, %v1059_v20, -inf }
 0x66c   : > { %v1045_v8 = vsel %vm1043_vm4, %v1035_v21, %v987_v38   ;;  %1068 = vmax.xlane.f32.xlu1 (%p561_p2), %v1067_v24 }
 0x66d   : > { %v2059_v26 = vmov %v1045_v8  ;;  %1047 = vst [vmem:[#allocation4] sm:$0xf] (%p561_p2), %v1045_v8  ;;  %v1065_v4 = vsel (%p561_p2), %vm1064_vm3, %v1045_v8, -1e+09 }
 0x66e   :  { %v1070_v5 = vsel %vm1066_vm5, %v1065_v4, -inf }
 0x670   :  { %1071 = vmax.xlane.f32.xlu1 %v1070_v5 }
 0x6f9   :  { %v1069_v18 = vpop.xlane.xlu1 %1068 }
 0x6fd   :  { %v1072_v29 = vpop.xlane.xlu1 %1071 }
 0x6fe   :  { %v1073_v23 = vmax.f32 %v1069_v18, %v1072_v29 }
 0x700   :  { %v1074_v54 = vsub.f32 %v1059_v20, %v1073_v23  ;;  %v1080_v50 = vsub.f32 %v1065_v4, %v1073_v23 }
 0x702   :  { %v1075_v36 = vmul.f32 1.442695, %v1074_v54  ;;  %v1081_v57 = vmul.f32 1.442695, %v1080_v50 }
 0x704   :  { %1392 = vpow2.f32 %v1075_v36 }
 0x705   :  { %1394 = vpow2.f32 %v1081_v57 }
 0x70e   :  { %v1393_v37 = vpop.eup %1392 }
 0x70f   :  { %v1395_v14 = vpop.eup %1394  ;;  %v1077_v52 = vsel %vm1066_vm5, %v1393_v37, 0.0 }
 0x710   :  { %v1083_v38 = vsel %vm1066_vm5, %v1395_v14, 0.0  ;;  %1078 = vadd.xlane.f32.xlu0 %v1077_v52 }
 0x711   :  { %1084 = vadd.xlane.f32.xlu1 %v1083_v38 }
 0x712   :  { %1455 = shalt.err (!%p1452_p7)
}
 0x713   :  { %s1456_s23 = scalar_lea.hbm %s2058_s7, 64 }
 0x714   :  { %p1457_p8 = scmp.ne.s32.totalorder %s2058_s7, %s1456_s23  ;;  %p1460_p9 = scmp.lt.u32.totalorder %s1456_s23, %s2058_s7 }
 0x716   :  { %p1462_p10 = pnand %p1460_p9, %p1457_p8 }
 0x718   :  { %1465 = shalt.err (!%p1462_p10)
}
 0x719   :  { %1111 = dma.vmem_to_hbm [thread:$0]  %s1109_s19, 64, %s2058_s7, [#allocation8]   ;;  %vm1093_vm0 = vcmp.gt.s32.totalorder %v1054_v44, 1  ;;  %vm1098_vm15 = vcmask 3072  }
 0x71a   :  { %v1094_v31 = vsel %vm1093_vm0, %v1054_v44, 1 }
 0x71b   :  { %v1095_v32 = vcvt.s32.f32 %v1094_v31 }
 0x79d   :  { %v1079_v48 = vpop.xlane.xlu0 %1078 }
 0x79e   :  { %v1085_v35 = vpop.xlane.xlu1 %1084 }
 0x79f   :  { %v1086_v39 = vadd.f32 %v1085_v35, %v1079_v48 }
 0x7a1   :  { %1396 = vlog2.f32 %v1086_v39 }
 0x7a2   :  { %1398 = vrcp.f32 %v1095_v32 }
 0x7ab   :  { %v1397_v26 = vpop.eup %1396 }
 0x7ac   :  { %v1088_v62 = vmul.f32 0.6931472, %v1397_v26  ;;  %v1399_v10 = vpop.eup %1398 }
 0x7ae   :  { %v1089_v0 = vadd.f32 %v1088_v62, %v1073_v23 }
 0x7b0   :  { %v1090_v58 = vsub.f32 0.0, %v1089_v0 }
 0x7b2   :  { %vm1091_vm14 = vcmp.gt.f32.partialorder %v1090_v58, 1e+08 }
 0x7b3   :  { %v1092_v7 = vsel %vm1091_vm14, 0.0, %v1090_v58 }
 0x7b4   :  { %v1097_v60 = vmul.f32 %v1399_v10, %v1092_v7 }
 0x7b6   :  { %1099 = vst.msk [vmem:[%s2057_s6] sm:$0xf] %vm1098_vm15, %v1097_v60 }
 0x7b7   :  { %1482 = dma.done.wait [#allocation8], 64  }
 0x7b8   :  { %1483 = vsyncadd [#allocation8], 4294967232 }
 0x7b9   :  { %1117 = vsyncpa [#allocation7], 1 }
 0x7ba   :  { %1118 = vsyncpa [#allocation10], 1 }
 0x7bb   :  { %1119 = vsyncpa [#allocation8], 1 }

</bundles_post_ra>
